<compile_context>
chip_gen: v7x
topology: tpu7x:2x2x1
jax: 0.10.0
libtpu: 0.0.40
codegen_flags: <defaults>
</compile_context>

<pallas_src>
import functools

import jax
import jax.numpy as jnp
from jax.experimental import pallas as pl
from jax.experimental.pallas import tpu as pltpu

EPS = 1e-5  # nn.BatchNorm2d default

# MXU operand dtype.  bf16 is MXU-native on v5e/v6e/v7x and halves matmul
# operand bytes (accumulation stays f32 via preferred_element_type), but at this
# tiny C=4 validation size its operand rounding (~5e-3 abs) would exceed the
# 1e-3 check tolerance, so the check runs with f32 operands.
MATMUL_DTYPE = jnp.float32


# ------------------------------ fused kernel ------------------------------- #

def _residual_block_kernel(xg_ref, mask_ref,
                           w1_ref, b1_ref, g1_ref, be1_ref,
                           w2_ref, b2_ref, g2_ref, be2_ref,
                           o_ref, zg_ref,
                           *, wp, ppad, guard, inv_count, mm_dtype):
    """Whole residual block on VMEM-resident, lane-dense (Cp, positions) data.

    xg_ref   : (Cp, G + Ppad + G) zero-padded, flattened input with lane guards
    mask_ref : (1, Ppad)          1.0 at real pixels, 0.0 at pad ring / tail
    w*_ref   : (Cp, 9*Cp)         conv weights, columns ordered tap-major
    b*/g*/be*: (Cp, 1)            conv bias / BN gamma / BN beta per channel
    o_ref    : (Cp, Ppad)         lane-dense output on the padded grid
    zg_ref   : (Cp, G + Ppad + G) VMEM scratch for the guarded hidden activation
    """
    mask = mask_ref[...]                              # (1, Ppad), broadcasts over Cp

    def conv3x3(src_ref, w_ref, b_ref):
        # Gather the 9 shifted tap windows (static lane-offset slices of the
        # guarded ref; zero guards / zero pad ring keep interior taps exact),
        # concatenate into an im2col slab, ONE MXU matmul per conv.
        taps = []
        for dy in range(3):
            for dx in range(3):
                ofs = (dy - 1) * wp + (dx - 1)
                taps.append(src_ref[:, guard + ofs: guard + ofs + ppad])
        slab = jnp.concatenate(taps, axis=0).astype(mm_dtype)    # (9*Cp, Ppad)
        y = jnp.dot(w_ref[...], slab, preferred_element_type=jnp.float32)
        return y + b_ref[...]                                    # (Cp, Ppad) f32

    def bn_scale_shift(y, gamma, beta):
        # Per-channel training-mode batch stats over the N*H*W real pixels
        # (lane-axis reduce -> XLU).  The `* mask` terms are load-bearing:
        # pad-ring conv outputs are garbage and must not pollute the stats.
        # Two-pass (mean-shifted) variance in f32 avoids cancellation.
        mean = jnp.sum(y * mask, axis=1, keepdims=True) * inv_count
        cen = (y - mean) * mask
        var = jnp.sum(cen * cen, axis=1, keepdims=True) * inv_count
        scale = gamma * jax.lax.rsqrt(var + EPS)
        shift = beta - mean * scale
        return scale, shift

    # ---- conv1 -> bn1 (batch stats) -> relu ---------------------------------
    y1 = conv3x3(xg_ref, w1_ref, b1_ref)
    sc1, sh1 = bn_scale_shift(y1, g1_ref[...], be1_ref[...])
    # mask re-zeroes the pad ring so conv2's taps see zero padding there.
    z1 = jnp.maximum(y1 * sc1 + sh1, 0.0) * mask

    # Stage the hidden activation into the guarded scratch.  Only the guard
    # bands are zero-filled (the pad ring inside z1 is already zero via mask).
    cc = zg_ref.shape[0]
    zg_ref[:, :guard] = jnp.zeros((cc, guard), jnp.float32)
    zg_ref[:, guard + ppad:] = jnp.zeros(
        (cc, zg_ref.shape[1] - guard - ppad), jnp.float32)
    zg_ref[:, guard:guard + ppad] = z1

    # ---- conv2 -> bn2 (batch stats) -> +residual -> relu --------------------
    y2 = conv3x3(zg_ref, w2_ref, b2_ref)
    sc2, sh2 = bn_scale_shift(y2, g2_ref[...], be2_ref[...])
    res = xg_ref[:, guard:guard + ppad]               # padded input == residual
    o_ref[...] = jnp.maximum(y2 * sc2 + sh2 + res, 0.0) * mask


# ------------------------------ Python wrapper ------------------------------ #

def residual_block(x_nchw, params):
    """Pallas implementation of ResidualBlock.forward (stride=1, downsample=None)."""
    w1, b1, g1, be1, w2, b2, g2, be2 = params
    N, C, H, W = x_nchw.shape
    Hp, Wp = H + 2, W + 2
    Cp = ((C + 7) // 8) * 8                 # sublane-aligned channel count
    P = N * Hp * Wp                         # flattened padded positions
    Ppad = ((P + 127) // 128) * 128         # lane-dense (multiple of 128)
    G = 128                                 # lane guard >= max tap offset (Wp+1)
    L = G + Ppad + G

    # NCHW -> (Cp, positions): channel-major, zero-padded spatial grid flattened
    # onto the lane axis, plus zero guard bands for the static tap windows.
    x_nhwc = jnp.transpose(x_nchw, (0, 2, 3, 1)).astype(jnp.float32)
    xp = jnp.pad(x_nhwc, ((0, 0), (1, 1), (1, 1), (0, Cp - C)))   # (N,Hp,Wp,Cp)
    x_cp = jnp.transpose(xp, (3, 0, 1, 2)).reshape(Cp, P)
    xg = jnp.pad(x_cp, ((0, 0), (G, G + (Ppad - P))))             # (Cp, L)

    # Single-row real-pixel mask (broadcast over channels inside the kernel).
    mask = jnp.pad(jnp.ones((N, H, W), jnp.float32),
                   ((0, 0), (1, 1), (1, 1))).reshape(1, P)
    mask = jnp.pad(mask, ((0, 0), (0, Ppad - P)))                 # (1, Ppad)

    def conv_w(w):
        # HWIO (3,3,C,C) -> (Cp, 9*Cp): rows = cout, columns = tap*Cp + cin
        # (tap-major, matching the im2col slab built inside the kernel).
        wk = jnp.pad(w.astype(jnp.float32).reshape(9, C, C),
                     ((0, 0), (0, Cp - C), (0, Cp - C)))
        return wk.transpose(2, 0, 1).reshape(Cp, 9 * Cp).astype(MATMUL_DTYPE)

    def col(v):    # (C,) -> (Cp, 1)
        return jnp.pad(v.astype(jnp.float32), (0, Cp - C)).reshape(Cp, 1)

    kernel = functools.partial(
        _residual_block_kernel, wp=Wp, ppad=Ppad, guard=G,
        inv_count=1.0 / float(N * H * W), mm_dtype=MATMUL_DTYPE)

    # Whole problem (~100 KB) fits in VMEM -> gridless, whole-array blocks.
    # At real ResNet sizes: add a ("parallel", ...) grid over 8-aligned row
    # blocks with a 1-row halo and a cross-block BN reduction, with per-block
    # VMEM sized against v7x's 64 MiB / 2 TensorCores.
    out_cp = pl.pallas_call(
        kernel,
        out_shape=jax.ShapeDtypeStruct((Cp, Ppad), jnp.float32),
        scratch_shapes=[pltpu.VMEM((Cp, L), jnp.float32)],
        compiler_params=pltpu.CompilerParams(
            vmem_limit_bytes=32 * 1024 * 1024),
    )(xg, mask,
      conv_w(w1), col(b1), col(g1), col(be1),
      conv_w(w2), col(b2), col(g2), col(be2))

    # Drop channel/lane padding and the spatial ring, back to NCHW (tiny XLA op).
    out = out_cp[:C, :P].reshape(C, N, Hp, Wp)[:, :, 1:H + 1, 1:W + 1]
    return jnp.transpose(out, (1, 0, 2, 3))


# ------------------------------ pure-JAX reference --------------------------- #

def residual_block_reference(x_nchw, params):
    w1, b1, g1, be1, w2, b2, g2, be2 = params
    x = jnp.transpose(x_nchw, (0, 2, 3, 1)).astype(jnp.float32)

    def conv(x, w, b):
        y = jax.lax.conv_general_dilated(
            x, w, window_strides=(1, 1), padding="SAME",
            dimension_numbers=("NHWC", "HWIO", "NHWC"))
        return y + b

    def bn(y, gamma, beta):
        mean = y.mean(axis=(0, 1, 2))
        var = y.var(axis=(0, 1, 2))  # biased, matches training-mode normalization
        return (y - mean) / jnp.sqrt(var + EPS) * gamma + beta

    out = jax.nn.relu(bn(conv(x, w1, b1), g1, be1))
    out = bn(conv(out, w2, b2), g2, be2)
    out = jax.nn.relu(out + x)
    return jnp.transpose(out, (0, 3, 1, 2))


# ----------------------------------- main ------------------------------------ #

if __name__ == "__main__":
    N, C, H, W = 2, 4, 16, 16  # in_channels == out_channels, stride=1, downsample=None

    key = jax.random.PRNGKey(0)
    keys = jax.random.split(key, 10)
    x = jax.random.normal(keys[0], (N, C, H, W), jnp.float32)

    # deterministic synthetic parameters (shapes from nn.Conv2d / nn.BatchNorm2d)
    w1 = 0.2 * jax.random.normal(keys[1], (3, 3, C, C), jnp.float32)   # HWIO
    b1 = 0.1 * jax.random.normal(keys[2], (C,), jnp.float32)
    g1 = 1.0 + 0.1 * jax.random.normal(keys[3], (C,), jnp.float32)
    be1 = 0.1 * jax.random.normal(keys[4], (C,), jnp.float32)
    w2 = 0.2 * jax.random.normal(keys[5], (3, 3, C, C), jnp.float32)
    b2 = 0.1 * jax.random.normal(keys[6], (C,), jnp.float32)
    g2 = 1.0 + 0.1 * jax.random.normal(keys[7], (C,), jnp.float32)
    be2 = 0.1 * jax.random.normal(keys[8], (C,), jnp.float32)
    params = (w1, b1, g1, be1, w2, b2, g2, be2)

    fwd = jax.jit(residual_block)
    out = jax.block_until_ready(fwd(x, params))
    ref = jax.block_until_ready(residual_block_reference(x, params))

    assert out.shape == (N, C, H, W)
    max_err = float(jnp.max(jnp.abs(out - ref)))
    assert jnp.allclose(out, ref, atol=1e-3, rtol=1e-3), max_err

    print("KERNEL_OK")
</pallas_src>

<mosaic_0001>
module attributes {stable_mosaic.version = 11 : i64} {
  func.func @_residual_block_kernel(%arg0: memref<8x1024xf32, #tpu.memory_space<vmem>>, %arg1: memref<1x768xf32, #tpu.memory_space<vmem>>, %arg2: memref<8x72xf32, #tpu.memory_space<vmem>>, %arg3: memref<8x1xf32, #tpu.memory_space<vmem>>, %arg4: memref<8x1xf32, #tpu.memory_space<vmem>>, %arg5: memref<8x1xf32, #tpu.memory_space<vmem>>, %arg6: memref<8x72xf32, #tpu.memory_space<vmem>>, %arg7: memref<8x1xf32, #tpu.memory_space<vmem>>, %arg8: memref<8x1xf32, #tpu.memory_space<vmem>>, %arg9: memref<8x1xf32, #tpu.memory_space<vmem>>, %arg10: memref<8x768xf32, #tpu.memory_space<vmem>>, %arg11: memref<8x1024xf32, #tpu.memory_space<vmem>>) attributes {dimension_semantics = [], scalar_prefetch = 0 : i64, scratch_operands = 1 : i64, tpu.core_type = #tpu.core_type<tc>} {
    %c0 = arith.constant 0 : index
    %c0_0 = arith.constant 0 : index
    %0 = vector.load %arg1[%c0, %c0_0] : memref<1x768xf32, #tpu.memory_space<vmem>>, vector<1x768xf32>
    %c0_1 = arith.constant 0 : index
    %c109 = arith.constant 109 : index
    %1 = vector.load %arg0[%c0_1, %c109] : memref<8x1024xf32, #tpu.memory_space<vmem>>, vector<8x768xf32>
    %c0_2 = arith.constant 0 : index
    %c110 = arith.constant 110 : index
    %2 = vector.load %arg0[%c0_2, %c110] : memref<8x1024xf32, #tpu.memory_space<vmem>>, vector<8x768xf32>
    %c0_3 = arith.constant 0 : index
    %c111 = arith.constant 111 : index
    %3 = vector.load %arg0[%c0_3, %c111] : memref<8x1024xf32, #tpu.memory_space<vmem>>, vector<8x768xf32>
    %c0_4 = arith.constant 0 : index
    %c127 = arith.constant 127 : index
    %4 = vector.load %arg0[%c0_4, %c127] : memref<8x1024xf32, #tpu.memory_space<vmem>>, vector<8x768xf32>
    %c0_5 = arith.constant 0 : index
    %c128 = arith.constant 128 : index
    %5 = vector.load %arg0[%c0_5, %c128] : memref<8x1024xf32, #tpu.memory_space<vmem>>, vector<8x768xf32>
    %c0_6 = arith.constant 0 : index
    %c129 = arith.constant 129 : index
    %6 = vector.load %arg0[%c0_6, %c129] : memref<8x1024xf32, #tpu.memory_space<vmem>>, vector<8x768xf32>
    %c0_7 = arith.constant 0 : index
    %c145 = arith.constant 145 : index
    %7 = vector.load %arg0[%c0_7, %c145] : memref<8x1024xf32, #tpu.memory_space<vmem>>, vector<8x768xf32>
    %c0_8 = arith.constant 0 : index
    %c146 = arith.constant 146 : index
    %8 = vector.load %arg0[%c0_8, %c146] : memref<8x1024xf32, #tpu.memory_space<vmem>>, vector<8x768xf32>
    %c0_9 = arith.constant 0 : index
    %c147 = arith.constant 147 : index
    %9 = vector.load %arg0[%c0_9, %c147] : memref<8x1024xf32, #tpu.memory_space<vmem>>, vector<8x768xf32>
    %10 = tpu.concatenate %1, %2, %3, %4, %5, %6, %7, %8, %9 in 0 : vector<8x768xf32>, vector<8x768xf32>, vector<8x768xf32>, vector<8x768xf32>, vector<8x768xf32>, vector<8x768xf32>, vector<8x768xf32>, vector<8x768xf32>, vector<8x768xf32> -> vector<72x768xf32>
    %c0_10 = arith.constant 0 : index
    %c0_11 = arith.constant 0 : index
    %11 = vector.load %arg2[%c0_10, %c0_11] : memref<8x72xf32, #tpu.memory_space<vmem>>, vector<8x72xf32>
    %cst = arith.constant dense<0.000000e+00> : vector<8x768xf32>
    %12 = tpu.matmul %11, %10, %cst {dimension_numbers = #tpu.dot_dimension_numbers<[1], [0], [0], [1], [0, 0, 1, 1], [], []>} : vector<8x72xf32>, vector<72x768xf32>, vector<8x768xf32> -> vector<8x768xf32>
    %c0_12 = arith.constant 0 : index
    %c0_13 = arith.constant 0 : index
    %13 = vector.load %arg3[%c0_12, %c0_13] : memref<8x1xf32, #tpu.memory_space<vmem>>, vector<8x1xf32>
    %14 = vector.broadcast %13 : vector<8x1xf32> to vector<8x768xf32>
    %15 = arith.addf %12, %14 : vector<8x768xf32>
    %c0_14 = arith.constant 0 : index
    %c0_15 = arith.constant 0 : index
    %16 = vector.load %arg4[%c0_14, %c0_15] : memref<8x1xf32, #tpu.memory_space<vmem>>, vector<8x1xf32>
    %c0_16 = arith.constant 0 : index
    %c0_17 = arith.constant 0 : index
    %17 = vector.load %arg5[%c0_16, %c0_17] : memref<8x1xf32, #tpu.memory_space<vmem>>, vector<8x1xf32>
    %18 = vector.broadcast %0 : vector<1x768xf32> to vector<8x768xf32>
    %19 = arith.mulf %15, %18 : vector<8x768xf32>
    %cst_18 = arith.constant dense<0.000000e+00> : vector<8xf32>
    %20 = vector.multi_reduction <add>, %19, %cst_18 [1] : vector<8x768xf32> to vector<8xf32>
    %21 = vector.shape_cast %20 : vector<8xf32> to vector<8x1xf32>
    %cst_19 = arith.constant 0.001953125 : f32
    %22 = vector.broadcast %cst_19 : f32 to vector<8x1xf32>
    %23 = arith.mulf %21, %22 : vector<8x1xf32>
    %24 = vector.broadcast %23 : vector<8x1xf32> to vector<8x768xf32>
    %25 = arith.subf %15, %24 : vector<8x768xf32>
    %26 = vector.broadcast %0 : vector<1x768xf32> to vector<8x768xf32>
    %27 = arith.mulf %25, %26 : vector<8x768xf32>
    %28 = arith.mulf %27, %27 : vector<8x768xf32>
    %cst_20 = arith.constant dense<0.000000e+00> : vector<8xf32>
    %29 = vector.multi_reduction <add>, %28, %cst_20 [1] : vector<8x768xf32> to vector<8xf32>
    %30 = vector.shape_cast %29 : vector<8xf32> to vector<8x1xf32>
    %cst_21 = arith.constant 0.001953125 : f32
    %31 = vector.broadcast %cst_21 : f32 to vector<8x1xf32>
    %32 = arith.mulf %30, %31 : vector<8x1xf32>
    %cst_22 = arith.constant 9.99999974E-6 : f32
    %33 = vector.broadcast %cst_22 : f32 to vector<8x1xf32>
    %34 = arith.addf %32, %33 : vector<8x1xf32>
    %35 = math.rsqrt %34 : vector<8x1xf32>
    %36 = arith.mulf %16, %35 : vector<8x1xf32>
    %37 = arith.mulf %23, %36 : vector<8x1xf32>
    %38 = arith.subf %17, %37 : vector<8x1xf32>
    %39 = vector.broadcast %36 : vector<8x1xf32> to vector<8x768xf32>
    %40 = arith.mulf %15, %39 : vector<8x768xf32>
    %41 = vector.broadcast %38 : vector<8x1xf32> to vector<8x768xf32>
    %42 = arith.addf %40, %41 : vector<8x768xf32>
    %cst_23 = arith.constant 0.000000e+00 : f32
    %43 = vector.broadcast %cst_23 : f32 to vector<8x768xf32>
    %44 = arith.maximumf %42, %43 : vector<8x768xf32>
    %45 = vector.broadcast %0 : vector<1x768xf32> to vector<8x768xf32>
    %46 = arith.mulf %44, %45 : vector<8x768xf32>
    %cst_24 = arith.constant 0.000000e+00 : f32
    %47 = vector.broadcast %cst_24 : f32 to vector<8x128xf32>
    %c0_25 = arith.constant 0 : index
    %c0_26 = arith.constant 0 : index
    %48 = vector.load %arg11[%c0_25, %c0_26] : memref<8x1024xf32, #tpu.memory_space<vmem>>, vector<8x128xf32>
    tpu.vector_store %arg11[%c0_25, %c0_26], %47 {strides = array<i32>} : memref<8x1024xf32, #tpu.memory_space<vmem>>, vector<8x128xf32>,
    %cst_27 = arith.constant 0.000000e+00 : f32
    %49 = vector.broadcast %cst_27 : f32 to vector<8x128xf32>
    %c0_28 = arith.constant 0 : index
    %c896 = arith.constant 896 : index
    %50 = vector.load %arg11[%c0_28, %c896] : memref<8x1024xf32, #tpu.memory_space<vmem>>, vector<8x128xf32>
    tpu.vector_store %arg11[%c0_28, %c896], %49 {strides = array<i32>} : memref<8x1024xf32, #tpu.memory_space<vmem>>, vector<8x128xf32>,
    %c0_29 = arith.constant 0 : index
    %c128_30 = arith.constant 128 : index
    %51 = vector.load %arg11[%c0_29, %c128_30] : memref<8x1024xf32, #tpu.memory_space<vmem>>, vector<8x768xf32>
    tpu.vector_store %arg11[%c0_29, %c128_30], %46 {strides = array<i32>} : memref<8x1024xf32, #tpu.memory_space<vmem>>, vector<8x768xf32>,
    %c0_31 = arith.constant 0 : index
    %c109_32 = arith.constant 109 : index
    %52 = vector.load %arg11[%c0_31, %c109_32] : memref<8x1024xf32, #tpu.memory_space<vmem>>, vector<8x768xf32>
    %c0_33 = arith.constant 0 : index
    %c110_34 = arith.constant 110 : index
    %53 = vector.load %arg11[%c0_33, %c110_34] : memref<8x1024xf32, #tpu.memory_space<vmem>>, vector<8x768xf32>
    %c0_35 = arith.constant 0 : index
    %c111_36 = arith.constant 111 : index
    %54 = vector.load %arg11[%c0_35, %c111_36] : memref<8x1024xf32, #tpu.memory_space<vmem>>, vector<8x768xf32>
    %c0_37 = arith.constant 0 : index
    %c127_38 = arith.constant 127 : index
    %55 = vector.load %arg11[%c0_37, %c127_38] : memref<8x1024xf32, #tpu.memory_space<vmem>>, vector<8x768xf32>
    %c0_39 = arith.constant 0 : index
    %c128_40 = arith.constant 128 : index
    %56 = vector.load %arg11[%c0_39, %c128_40] : memref<8x1024xf32, #tpu.memory_space<vmem>>, vector<8x768xf32>
    %c0_41 = arith.constant 0 : index
    %c129_42 = arith.constant 129 : index
    %57 = vector.load %arg11[%c0_41, %c129_42] : memref<8x1024xf32, #tpu.memory_space<vmem>>, vector<8x768xf32>
    %c0_43 = arith.constant 0 : index
    %c145_44 = arith.constant 145 : index
    %58 = vector.load %arg11[%c0_43, %c145_44] : memref<8x1024xf32, #tpu.memory_space<vmem>>, vector<8x768xf32>
    %c0_45 = arith.constant 0 : index
    %c146_46 = arith.constant 146 : index
    %59 = vector.load %arg11[%c0_45, %c146_46] : memref<8x1024xf32, #tpu.memory_space<vmem>>, vector<8x768xf32>
    %c0_47 = arith.constant 0 : index
    %c147_48 = arith.constant 147 : index
    %60 = vector.load %arg11[%c0_47, %c147_48] : memref<8x1024xf32, #tpu.memory_space<vmem>>, vector<8x768xf32>
    %61 = tpu.concatenate %52, %53, %54, %55, %56, %57, %58, %59, %60 in 0 : vector<8x768xf32>, vector<8x768xf32>, vector<8x768xf32>, vector<8x768xf32>, vector<8x768xf32>, vector<8x768xf32>, vector<8x768xf32>, vector<8x768xf32>, vector<8x768xf32> -> vector<72x768xf32>
    %c0_49 = arith.constant 0 : index
    %c0_50 = arith.constant 0 : index
    %62 = vector.load %arg6[%c0_49, %c0_50] : memref<8x72xf32, #tpu.memory_space<vmem>>, vector<8x72xf32>
    %cst_51 = arith.constant dense<0.000000e+00> : vector<8x768xf32>
    %63 = tpu.matmul %62, %61, %cst_51 {dimension_numbers = #tpu.dot_dimension_numbers<[1], [0], [0], [1], [0, 0, 1, 1], [], []>} : vector<8x72xf32>, vector<72x768xf32>, vector<8x768xf32> -> vector<8x768xf32>
    %c0_52 = arith.constant 0 : index
    %c0_53 = arith.constant 0 : index
    %64 = vector.load %arg7[%c0_52, %c0_53] : memref<8x1xf32, #tpu.memory_space<vmem>>, vector<8x1xf32>
    %65 = vector.broadcast %64 : vector<8x1xf32> to vector<8x768xf32>
    %66 = arith.addf %63, %65 : vector<8x768xf32>
    %c0_54 = arith.constant 0 : index
    %c0_55 = arith.constant 0 : index
    %67 = vector.load %arg8[%c0_54, %c0_55] : memref<8x1xf32, #tpu.memory_space<vmem>>, vector<8x1xf32>
    %c0_56 = arith.constant 0 : index
    %c0_57 = arith.constant 0 : index
    %68 = vector.load %arg9[%c0_56, %c0_57] : memref<8x1xf32, #tpu.memory_space<vmem>>, vector<8x1xf32>
    %69 = vector.broadcast %0 : vector<1x768xf32> to vector<8x768xf32>
    %70 = arith.mulf %66, %69 : vector<8x768xf32>
    %cst_58 = arith.constant dense<0.000000e+00> : vector<8xf32>
    %71 = vector.multi_reduction <add>, %70, %cst_58 [1] : vector<8x768xf32> to vector<8xf32>
    %72 = vector.shape_cast %71 : vector<8xf32> to vector<8x1xf32>
    %cst_59 = arith.constant 0.001953125 : f32
    %73 = vector.broadcast %cst_59 : f32 to vector<8x1xf32>
    %74 = arith.mulf %72, %73 : vector<8x1xf32>
    %75 = vector.broadcast %74 : vector<8x1xf32> to vector<8x768xf32>
    %76 = arith.subf %66, %75 : vector<8x768xf32>
    %77 = vector.broadcast %0 : vector<1x768xf32> to vector<8x768xf32>
    %78 = arith.mulf %76, %77 : vector<8x768xf32>
    %79 = arith.mulf %78, %78 : vector<8x768xf32>
    %cst_60 = arith.constant dense<0.000000e+00> : vector<8xf32>
    %80 = vector.multi_reduction <add>, %79, %cst_60 [1] : vector<8x768xf32> to vector<8xf32>
    %81 = vector.shape_cast %80 : vector<8xf32> to vector<8x1xf32>
    %cst_61 = arith.constant 0.001953125 : f32
    %82 = vector.broadcast %cst_61 : f32 to vector<8x1xf32>
    %83 = arith.mulf %81, %82 : vector<8x1xf32>
    %cst_62 = arith.constant 9.99999974E-6 : f32
    %84 = vector.broadcast %cst_62 : f32 to vector<8x1xf32>
    %85 = arith.addf %83, %84 : vector<8x1xf32>
    %86 = math.rsqrt %85 : vector<8x1xf32>
    %87 = arith.mulf %67, %86 : vector<8x1xf32>
    %88 = arith.mulf %74, %87 : vector<8x1xf32>
    %89 = arith.subf %68, %88 : vector<8x1xf32>
    %c0_63 = arith.constant 0 : index
    %c128_64 = arith.constant 128 : index
    %90 = vector.load %arg0[%c0_63, %c128_64] : memref<8x1024xf32, #tpu.memory_space<vmem>>, vector<8x768xf32>
    %91 = vector.broadcast %87 : vector<8x1xf32> to vector<8x768xf32>
    %92 = arith.mulf %66, %91 : vector<8x768xf32>
    %93 = vector.broadcast %89 : vector<8x1xf32> to vector<8x768xf32>
    %94 = arith.addf %92, %93 : vector<8x768xf32>
    %95 = arith.addf %94, %90 : vector<8x768xf32>
    %cst_65 = arith.constant 0.000000e+00 : f32
    %96 = vector.broadcast %cst_65 : f32 to vector<8x768xf32>
    %97 = arith.maximumf %95, %96 : vector<8x768xf32>
    %98 = vector.broadcast %0 : vector<1x768xf32> to vector<8x768xf32>
    %99 = arith.mulf %97, %98 : vector<8x768xf32>
    %c0_66 = arith.constant 0 : index
    %c0_67 = arith.constant 0 : index
    %100 = vector.load %arg10[%c0_66, %c0_67] : memref<8x768xf32, #tpu.memory_space<vmem>>, vector<8x768xf32>
    tpu.vector_store %arg10[%c0_66, %c0_67], %99 {strides = array<i32>} : memref<8x768xf32, #tpu.memory_space<vmem>>, vector<8x768xf32>,
    return
  }
}

</mosaic_0001>

<bundles_post_ra>
// kernel: residual_block.1
= control target key start
LH: loop header
LB: loop body
LE: loop exit
PB: predicated region body
PF: predicated region fallthrough
CT: control target
= control target key end

     0   :  { %s2162_s21 = smov 126   ;;  %s2163_s22 = smov 127   ;;  %vm71_vm0 = vcmask 1039360   ;;  %vm92_vm1 = vcmask 1031168   ;;  %vm113_vm2 = vcmask 900096   ;;  %vm159_vm3 = vcmask 883712   ;;  %s3161_s0 = inlined_call_operand.vmem [shape: f32[8,1024], index: 0, kind: input, shape index: {}]   ;;  %s3162_s3 = inlined_call_operand.vmem [shape: f32[8,1], index: 3, kind: input, shape index: {}]   ;;  %s3163_s2 = inlined_call_operand.vmem [shape: f32[8,72], index: 2, kind: input, shape index: {}]   ;;  %s3164_s1 = inlined_call_operand.vmem [shape: f32[1,768], index: 1, kind: input, shape index: {}]   ;;  %s3165_s4 = inlined_call_operand.vmem [shape: f32[8,1], index: 4, kind: input, shape index: {}]   ;;  %s3166_s5 = inlined_call_operand.vmem [shape: f32[8,1], index: 5, kind: input, shape index: {}]   ;;  %s3167_s7 = inlined_call_operand.vmem [shape: f32[8,1], index: 7, kind: input, shape index: {}]   ;;  %s3168_s6 = inlined_call_operand.vmem [shape: f32[8,72], index: 6, kind: input, shape index: {}]   ;;  %s3169_s8 = inlined_call_operand.vmem [shape: f32[8,1], index: 8, kind: input, shape index: {}]   ;;  %s3170_s9 = inlined_call_operand.vmem [shape: f32[8,1], index: 9, kind: input, shape index: {}]   ;;  %s3171_s10 = inlined_call_operand.vmem [shape: f32[8,768], index: 10, kind: output, shape index: {}]  }
   0x1   :  { %v37_v0 = vld [vmem:[%s3161_s0 + $0x8] sm:$0xff]  ;;  %v38_v1 = vld [vmem:[%s3161_s0 + $0x10] sm:$0xff]  ;;  %v2237_v2 = vld [vmem:[%s3161_s0] sm:$0xff]  ;;  %s2164_s25 = smov 110   ;;  %s2165_s26 = smov 109   ;;  %vm132_vm4 = vcmask 891904  }
   0x2   :  { %v1676_v3 = vpack.i.bf16 %v38_v1, %v37_v0  ;;  %v39_v4 = vld [vmem:[%s3161_s0 + $0x18] sm:$0xff]  ;;  %v40_v6 = vld [vmem:[%s3161_s0 + $0x20] sm:$0xff]  ;;  %s2166_s27 = smov 108   ;;  %s2167_s28 = smov 92   ;;  %v41_v8 = vld [vmem:[%s3161_s0 + $0x28] sm:$0xff]  ;;  %vm180_vm5 = vcmask 752640  }
   0x3   :  { %v1681_v5 = vpack.i.bf16 %v2237_v2, %v39_v4  ;;  %v1701_v7 = vpack.i.bf16 %v40_v6, %v39_v4  ;;  %s2168_s11 = smov 91   ;;  %v1736_v9 = vpack.i.bf16 %v41_v8, %v40_v6  ;;  %v42_v10 = vld [vmem:[%s3161_s0 + $0x30] sm:$0xff]  ;;  %s2169_s14 = smov 90   ;;  %v49_v12 = vld [vmem:[%s3161_s0 + $0x38] sm:$0xff]  ;;  %vm201_vm6 = vcmask 744448  }
   0x4   :  { %1677 = vrot.lane.b32.xlu1 %v1676_v3, %s2162_s21  ;;  %1667 = vrot.lane.b32.xlu0 %v1676_v3, %s2163_s22  ;;  %v1751_v11 = vpack.i.bf16 %v42_v10, %v41_v8  ;;  %s2170_s17 = smov 19   ;;  %vm222_vm7 = vcmask 736256   ;;  %vm362_vm8 = vcmask 154624   ;;  %vm471_vm9 = vcmask 588800  }
   0x8   :  { %1682 = vrot.lane.b32.xlu1 %v1681_v5, %s2162_s21  ;;  %1672 = vrot.lane.b32.xlu0 %v1681_v5, %s2163_s22 }
   0xc   :  { %1692 = vrot.lane.b32.xlu1 %v1681_v5, %s2164_s25  ;;  %1687 = vrot.lane.b32.xlu0 %v1676_v3, %s2164_s25 }
  0x10   :  { %1702 = vrot.lane.b32.xlu1 %v1701_v7, %s2165_s26  ;;  %1697 = vrot.lane.b32.xlu0 %v1676_v3, %s2165_s26 }
  0x14   :  { %1712 = vrot.lane.b32.xlu1 %v1701_v7, %s2166_s27  ;;  %1707 = vrot.lane.b32.xlu0 %v1676_v3, %s2166_s27 }
  0x18   :  { %1722 = vrot.lane.b32.xlu1 %v1701_v7, %s2167_s28  ;;  %1717 = vrot.lane.b32.xlu0 %v1676_v3, %s2167_s28 }
  0x1c   :  { %1732 = vrot.lane.b32.xlu1 %v1701_v7, %s2168_s11  ;;  %1727 = vrot.lane.b32.xlu0 %v1676_v3, %s2168_s11 }
  0x20   :  { %69 = vrot.lane.b32.xlu1 %v42_v10, %s2163_s22  ;;  %1737 = vrot.lane.b32.xlu0 %v1736_v9, %s2163_s22 }
  0x24   :  { %1747 = vrot.lane.b32.xlu1 %v1736_v9, %s2164_s25  ;;  %1742 = vrot.lane.b32.xlu0 %v1736_v9, %s2162_s21 }
  0x28   :  { %210 = vrot.lane.b32.xlu1 %v38_v1, %s2169_s14  ;;  %208 = vrot.lane.b32.xlu0 %v37_v0, %s2169_s14 }
  0x2c   :  { %90 = vrot.lane.b32.xlu1 %v42_v10, %s2162_s21  ;;  %212 = vrot.lane.b32.xlu0 %v39_v4, %s2169_s14 }
  0x30   :  { %1752 = vrot.lane.b32.xlu1 %v1751_v11, %s2165_s26  ;;  %111 = vrot.lane.b32.xlu0 %v42_v10, %s2164_s25 }
  0x34   :  { %157 = vrot.lane.b32.xlu1 %v49_v12, %s2166_s27  ;;  %1757 = vrot.lane.b32.xlu0 %v1751_v11, %s2166_s27 }
  0x38   :  { %1767 = vrot.lane.b32.xlu1 %v1751_v11, %s2168_s11  ;;  %1762 = vrot.lane.b32.xlu0 %v1751_v11, %s2167_s28 }
  0x3c   :  { %178 = vrot.lane.b32.xlu0 %v49_v12, %s2167_s28  ;;  %199 = vrot.lane.b32.xlu1 %v49_v12, %s2168_s11 }
  0x40   :  { %214 = vrot.lane.b32.xlu0 %v40_v6, %s2169_s14  ;;  %216 = vrot.lane.b32.xlu1 %v41_v8, %s2169_s14 }
  0x44   :  { %218 = vrot.lane.b32.xlu0 %v42_v10, %s2169_s14  ;;  %220 = vrot.lane.b32.xlu1 %v49_v12, %s2169_s14 }
  0x48   :  { %1772 = vrot.lane.b32.xlu0 %v1676_v3, %s2170_s17 }
  0x4c   :  { %1777 = vrot.lane.b32.xlu0 %v1701_v7, %s2170_s17 }
  0x50   :  { %1782 = vrot.lane.b32.xlu0 %v1751_v11, %s2170_s17 }
  0x76   :  { %v1678_v13 = vpop.permute.xlu1 %1677  ;;  %v1668_v14 = vpop.permute.xlu0 %1667 }
  0x77   :  { %v1670_v33 = vunpack.i.h.bf16 %v1668_v14  ;;  %v1669_v34 = vunpack.i.l.bf16 %v1668_v14  ;;  %v1680_v35 = vunpack.i.h.bf16 %v1678_v13  ;;  %v1679_v40 = vunpack.i.l.bf16 %v1678_v13 }
  0x79   :  { %v73_v42 = vsel %vm71_vm0, %v1669_v34, %v1670_v33  ;;  %v94_v45 = vsel %vm92_vm1, %v1679_v40, %v1680_v35 }
  0x7a   :  { %v2292_v15 = vpop.permute.xlu1 %1682  ;;  %v2294_v16 = vpop.permute.xlu0 %1672 }
  0x7b   :  { %v1674_v28 = vunpack.i.l.bf16 %v2294_v16  ;;  %v1684_v37 = vunpack.i.l.bf16 %v2292_v15  ;;  %v1675_v43 = vunpack.i.h.bf16 %v2294_v16  ;;  %v1685_v46 = vunpack.i.h.bf16 %v2292_v15 }
  0x7d   :  { %v74_v39 = vsel %vm71_vm0, %v1670_v33, %v1674_v28  ;;  %v95_v50 = vsel %vm92_vm1, %v1680_v35, %v1684_v37  ;;  %v72_v55 = vsel %vm71_vm0, %v1675_v43, %v1669_v34  ;;  %v93_v59 = vsel %vm92_vm1, %v1685_v46, %v1679_v40 }
  0x7e   :  { %v2296_v17 = vpop.permute.xlu1 %1692  ;;  %v1688_v18 = vpop.permute.xlu0 %1687  ;;  %v1796_v44 = vpack.i.bf16 %v74_v39, %v73_v42  ;;  %v1806_v54 = vpack.i.bf16 %v95_v50, %v94_v45  ;;  %v1801_v62 = vpack.i.bf16 %v72_v55, %v2237_v2 }
  0x7f   :  { %v1695_v47 = vunpack.i.h.bf16 %v2296_v17  ;;  %v1689_v48 = vunpack.i.l.bf16 %v1688_v18  ;;  %v1694_v51 = vunpack.i.l.bf16 %v2296_v17  ;;  %v1690_v52 = vunpack.i.h.bf16 %v1688_v18 }
  0x81   :  { %v114_v60 = vsel %vm113_vm2, %v1695_v47, %v1689_v48  ;;  %v115_v1 = vsel %vm113_vm2, %v1689_v48, %v1690_v52  ;;  %v116_v3 = vsel %vm113_vm2, %v1690_v52, %v1694_v51  ;;  %v2171_v47 = vmov 0.0  }
  0x82   :  { %v2298_v19 = vpop.permute.xlu1 %1702  ;;  %v2300_v20 = vpop.permute.xlu0 %1697  ;;  %v1816_v0 = vpack.i.bf16 %v114_v60, %v93_v59  ;;  %v1811_v8 = vpack.i.bf16 %v116_v3, %v115_v1  ;;  %539 = vmatprep.mubr.f32.mxu0 %v2171_v47  ;;  %610 = vmatprep.mubr.f32.mxu1 %v2171_v47 }
  0x83   :  { %v1699_v23 = vunpack.i.l.bf16 %v2300_v20  ;;  %v1700_v61 = vunpack.i.h.bf16 %v2300_v20  ;;  %v1704_v63 = vunpack.i.l.bf16 %v2298_v19 }
  0x85   :  { %v133_v9 = vsel %vm132_vm4, %v1699_v23, %v1700_v61  ;;  %v134_v13 = vsel %vm132_vm4, %v1700_v61, %v1704_v63 }
  0x86   :  { %v2302_v21 = vpop.permute.xlu1 %1712  ;;  %v1708_v22 = vpop.permute.xlu0 %1707 }
  0x87   :  { %v1709_v24 = vunpack.i.l.bf16 %v1708_v22  ;;  %v1714_v56 = vunpack.i.l.bf16 %v2302_v21  ;;  %v1710_v57 = vunpack.i.h.bf16 %v1708_v22 }
  0x89   :  { %v1786_v25 = vpack.i.bf16 %v1709_v24, %v1699_v23  ;;  %v160_v6 = vsel %vm159_vm3, %v1709_v24, %v1710_v57  ;;  %v161_v2 = vsel %vm159_vm3, %v1710_v57, %v1714_v56 }
  0x8a   :  { %v2307_v26 = vpop.permute.xlu1 %1722  ;;  %v2309_v27 = vpop.permute.xlu0 %1717  ;;  %v1826_v12 = vpack.i.bf16 %v161_v2, %v160_v6 }
  0x8b   :  { %1787 = vrot.lane.b32.xlu0 %v1786_v25, %s2170_s17  ;;  %v1719_v31 = vunpack.i.l.bf16 %v2309_v27  ;;  %v1724_v4 = vunpack.i.l.bf16 %v2307_v26  ;;  %v1720_v5 = vunpack.i.h.bf16 %v2309_v27  ;;  %v1821_v25 = vpack.i.bf16 %v134_v13, %v133_v9 }
  0x8d   :  { %v181_v20 = vsel %vm180_vm5, %v1719_v31, %v1720_v5  ;;  %v182_v22 = vsel %vm180_vm5, %v1720_v5, %v1724_v4 }
  0x8e   :  { %v2313_v29 = vpop.permute.xlu1 %1732  ;;  %v2315_v30 = vpop.permute.xlu0 %1727  ;;  %v1831_v33 = vpack.i.bf16 %v182_v22, %v181_v20  ;;  %v1725_v22 = vunpack.i.h.bf16 %v2307_v26 }
  0x8f   :  { %v1729_v32 = vunpack.i.l.bf16 %v2315_v30  ;;  %v1734_v10 = vunpack.i.l.bf16 %v2313_v29  ;;  %v1730_v11 = vunpack.i.h.bf16 %v2315_v30 }
  0x91   :  { %v1791_v36 = vpack.i.bf16 %v1729_v32, %v1719_v31  ;;  %v202_v34 = vsel %vm201_vm6, %v1729_v32, %v1730_v11  ;;  %v203_v27 = vsel %vm201_vm6, %v1730_v11, %v1734_v10 }
  0x92   :  { %v2324_v38 = vpop.permute.xlu0 %1737  ;;  %v2329_v41 = vpop.permute.xlu1 %69  ;;  %v1836_v32 = vpack.i.bf16 %v203_v27, %v202_v34 }
  0x93   :  { %1792 = vrot.lane.b32.xlu1 %v1791_v36, %s2170_s17  ;;  %v1740_v14 = vunpack.i.h.bf16 %v2324_v38  ;;  %v1739_v18 = vunpack.i.l.bf16 %v2324_v38 }
  0x95   :  { %v75_v36 = vsel %vm71_vm0, %v1674_v28, %v1739_v18  ;;  %v76_v38 = vsel %vm71_vm0, %v1739_v18, %v1740_v14  ;;  %v77_v40 = vsel %vm71_vm0, %v1740_v14, %v2329_v41 }
  0x96   :  { %v2337_v49 = vpop.permute.xlu0 %1742  ;;  %v2344_v53 = vpop.permute.xlu1 %1747  ;;  %v1841_v39 = vpack.i.bf16 %v76_v38, %v75_v36  ;;  %v1846_v46 = vpack.i.bf16 %v2329_v41, %v77_v40  ;;  %v183_v38 = vsel %vm180_vm5, %v1724_v4, %v1725_v22 }
  0x97   :  { %1797 = vrot.lane.b32.xlu1 %v1796_v44, %s2170_s17  ;;  %v1745_v31 = vunpack.i.h.bf16 %v2337_v49  ;;  %v1744_v35 = vunpack.i.l.bf16 %v2337_v49  ;;  %v1750_v42 = vunpack.i.h.bf16 %v2344_v53  ;;  %v1749_v43 = vunpack.i.l.bf16 %v2344_v53 }
  0x99   :  { %v96_v16 = vsel %vm92_vm1, %v1684_v37, %v1744_v35  ;;  %v97_v28 = vsel %vm92_vm1, %v1744_v35, %v1745_v31  ;;  %v117_v48 = vsel %vm113_vm2, %v1694_v51, %v1749_v43  ;;  %v118_v15 = vsel %vm113_vm2, %v1749_v43, %v1750_v42 }
  0x9a   :  { %v2348_v58 = vpop.permute.xlu0 %208  ;;  %v2368_v7 = vpop.permute.xlu1 %210  ;;  %v1851_v45 = vpack.i.bf16 %v97_v28, %v96_v16  ;;  %v1856_v50 = vpack.i.bf16 %v118_v15, %v117_v48  ;;  %v1715_v51 = vunpack.i.h.bf16 %v2302_v21  ;;  %v1735_v21 = vunpack.i.h.bf16 %v2313_v29 }
  0x9b   :  { %348 = vrot.lane.b32.xlu0 %v2348_v58, %s2170_s17  ;;  %1807 = vrot.lane.b32.xlu1 %v1806_v54, %s2170_s17  ;;  %v223_v17 = vsel %vm222_vm7, %v2348_v58, %v2368_v7  ;;  %v1705_v58 = vunpack.i.h.bf16 %v2298_v19  ;;  %v2172_v43 = vmov 0  }
  0x9c   :  { %v204_v19 = vsel %vm201_vm6, %v1734_v10, %v1735_v21  ;;  %1911 = vset.pattern.permute.xlu1 %v2172_v43  ;;  %1912 = vset.pattern.permute.xlu0 %v2172_v43 }
  0x9e   :  { %v2388_v23 = vpop.permute.xlu0 %212  ;;  %v91_v24 = vpop.permute.xlu1 %90 }
  0x9f   :  { %1802 = vrot.lane.b32.xlu0 %v1801_v62, %s2170_s17  ;;  %1817 = vrot.lane.b32.xlu1 %v1816_v0, %s2170_s17  ;;  %v98_v55 = vsel %vm92_vm1, %v1745_v31, %v91_v24  ;;  %v224_v59 = vsel %vm222_vm7, %v2368_v7, %v2388_v23  ;;  %v162_v62 = vsel %vm159_vm3, %v1714_v56, %v1715_v51 }
  0xa0   :  { %v1861_v3 = vpack.i.bf16 %v91_v24, %v98_v55  ;;  %v135_v56 = vsel %vm132_vm4, %v1704_v63, %v1705_v58 }
  0xa2   :  { %v112_v30 = vpop.permute.xlu0 %111  ;;  %v1753_v44 = vpop.permute.xlu1 %1752 }
  0xa3   :  { %1812 = vrot.lane.b32.xlu0 %v1811_v8, %s2170_s17  ;;  %1827 = vrot.lane.b32.xlu1 %v1826_v12, %s2170_s17  ;;  %v119_v41 = vsel %vm113_vm2, %v1750_v42, %v112_v30  ;;  %v1754_v57 = vunpack.i.l.bf16 %v1753_v44  ;;  %v1755_v6 = vunpack.i.h.bf16 %v1753_v44  ;;  %v230_v44 = vld [vmem:[%s3162_s3] sm:$0xff] }
  0xa4   :  { %v1866_v54 = vpack.i.bf16 %v112_v30, %v119_v41 }
  0xa5   :  { %v136_v7 = vsel %vm132_vm4, %v1705_v58, %v1754_v57  ;;  %v137_v20 = vsel %vm132_vm4, %v1754_v57, %v1755_v6 }
  0xa6   :  { %v1758_v37 = vpop.permute.xlu0 %1757  ;;  %v158_v49 = vpop.permute.xlu1 %157  ;;  %v1871_v12 = vpack.i.bf16 %v136_v7, %v135_v56  ;;  %v1881_v34 = vpack.i.bf16 %v1755_v6, %v137_v20 }
  0xa7   :  { %1822 = vrot.lane.b32.xlu0 %v1821_v25, %s2170_s17  ;;  %1832 = vrot.lane.b32.xlu1 %v1831_v33, %s2170_s17  ;;  %v1759_v52 = vunpack.i.l.bf16 %v1758_v37  ;;  %v1760_v53 = vunpack.i.h.bf16 %v1758_v37 }
  0xa9   :  { %v163_v60 = vsel %vm159_vm3, %v1715_v51, %v1759_v52  ;;  %v164_v0 = vsel %vm159_vm3, %v1759_v52, %v1760_v53  ;;  %v165_v1 = vsel %vm159_vm3, %v1760_v53, %v158_v49 }
  0xaa   :  { %v1768_v61 = vpop.permute.xlu1 %1767  ;;  %v1876_v5 = vpack.i.bf16 %v163_v60, %v162_v62  ;;  %v1763_v8 = vpop.permute.xlu0 %1762  ;;  %v1886_v9 = vpack.i.bf16 %v165_v1, %v164_v0 }
  0xab   :  { %1837 = vrot.lane.b32.xlu0 %v1836_v32, %s2170_s17  ;;  %1842 = vrot.lane.b32.xlu1 %v1841_v39, %s2170_s17  ;;  %v1769_v2 = vunpack.i.l.bf16 %v1768_v61  ;;  %v1770_v11 = vunpack.i.h.bf16 %v1768_v61  ;;  %v1764_v14 = vunpack.i.l.bf16 %v1763_v8  ;;  %v1765_v27 = vunpack.i.h.bf16 %v1763_v8 }
  0xad   :  { %v205_v18 = vsel %vm201_vm6, %v1735_v21, %v1769_v2  ;;  %v206_v24 = vsel %vm201_vm6, %v1769_v2, %v1770_v11  ;;  %v184_v31 = vsel %vm180_vm5, %v1725_v22, %v1764_v14  ;;  %v185_v29 = vsel %vm180_vm5, %v1764_v14, %v1765_v27 }
  0xae   :  { %v200_v13 = vpop.permute.xlu1 %199  ;;  %v179_v63 = vpop.permute.xlu0 %178  ;;  %v1896_v33 = vpack.i.bf16 %v205_v18, %v204_v19  ;;  %v1891_v30 = vpack.i.bf16 %v184_v31, %v183_v38 }
  0xaf   :  { %1852 = vrot.lane.b32.xlu0 %v1851_v45, %s2170_s17  ;;  %1847 = vrot.lane.b32.xlu1 %v1846_v46, %s2170_s17  ;;  %v207_v25 = vsel %vm201_vm6, %v1770_v11, %v200_v13  ;;  %v186_v10 = vsel %vm180_vm5, %v1765_v27, %v179_v63 }
  0xb0   :  { %v1906_v35 = vpack.i.bf16 %v207_v25, %v206_v24  ;;  %v1901_v40 = vpack.i.bf16 %v186_v10, %v185_v29 }
  0xb2   :  { %v217_v36 = vpop.permute.xlu1 %216  ;;  %v215_v32 = vpop.permute.xlu0 %214 }
  0xb3   :  { %350 = vrot.lane.b32.xlu0 %v223_v17, %s2170_s17  ;;  %1857 = vrot.lane.b32.xlu1 %v1856_v50, %s2170_s17  ;;  %v226_v39 = vsel %vm222_vm7, %v215_v32, %v217_v36  ;;  %v225_v16 = vsel %vm222_vm7, %v2388_v23, %v215_v32 }
  0xb6   :  { %v221_v42 = vpop.permute.xlu1 %220  ;;  %v219_v26 = vpop.permute.xlu0 %218 }
  0xb7   :  { %1867 = vrot.lane.b32.xlu0 %v1866_v54, %s2170_s17  ;;  %352 = vrot.lane.b32.xlu1 %v224_v59, %s2170_s17  ;;  %v228_v4 = vsel %vm222_vm7, %v219_v26, %v221_v42  ;;  %v227_v28 = vsel %vm222_vm7, %v217_v36, %v219_v26 }
  0xba   :  { %v2485_v45 = vpop.permute.xlu0 %1772 }
  0xbb   :  { %1877 = vrot.lane.b32.xlu0 %v1876_v5, %s2170_s17  ;;  %1862 = vrot.lane.b32.xlu1 %v1861_v3, %s2170_s17  ;;  %v1775_v15 = vunpack.i.h.bf16 %v2485_v45  ;;  %v1774_v37 = vunpack.i.l.bf16 %v2485_v45 }
  0xbd   :  { %v364_v17 = vsel %vm362_vm8, %v1774_v37, %v1775_v15 }
  0xbe   :  { %v2487_v46 = vpop.permute.xlu0 %1777 }
  0xbf   :  { %1887 = vrot.lane.b32.xlu0 %v1886_v9, %s2170_s17  ;;  %1872 = vrot.lane.b32.xlu1 %v1871_v12, %s2170_s17  ;;  %v1779_v27 = vunpack.i.l.bf16 %v2487_v46 }
  0xc2   :  { %v2489_v48 = vpop.permute.xlu0 %1782 }
  0xc3   :  { %1897 = vrot.lane.b32.xlu0 %v1896_v33, %s2170_s17  ;;  %1882 = vrot.lane.b32.xlu1 %v1881_v34, %s2170_s17  ;;  %v1780_v34 = vunpack.i.h.bf16 %v2487_v46 }
  0xc7   :  { %1907 = vrot.lane.b32.xlu0 %v1906_v35, %s2170_s17  ;;  %1892 = vrot.lane.b32.xlu1 %v1891_v30, %s2170_s17 }
  0xcb   :  { %1902 = vrot.lane.b32.xlu1 %v1901_v40, %s2170_s17  ;;  %356 = vrot.lane.b32.xlu0 %v226_v39, %s2170_s17 }
  0xcf   :  { %354 = vrot.lane.b32.xlu1 %v225_v16, %s2170_s17  ;;  %360 = vrot.lane.b32.xlu0 %v228_v4, %s2170_s17 }
  0xd3   :  { %358 = vrot.lane.b32.xlu1 %v227_v28, %s2170_s17 }
  0xd7   :  { %233 = vperm.xlu1 %1911, %v230_v44  }
  0xfd   :  { %v1788_v49 = vpop.permute.xlu0 %1787 }
  0xfe   :  { %v1790_v25 = vunpack.i.h.bf16 %v1788_v49  ;;  %v1789_v19 = vunpack.i.l.bf16 %v1788_v49  ;;  %v365_v49 = vsel %vm362_vm8, %v1775_v15, %v1779_v27 }
 0x105   :  { %v2491_v23 = vpop.permute.xlu1 %1792 }
 0x106   :  { %v1795_v10 = vunpack.i.h.bf16 %v2491_v23  ;;  %v1794_v32 = vunpack.i.l.bf16 %v2491_v23  ;;  %v366_v23 = vsel %vm362_vm8, %v1779_v27, %v1780_v34 }
 0x109   :  { %v2495_v50 = vpop.permute.xlu1 %1797 }
 0x10a   :  { %v1800_v41 = vunpack.i.h.bf16 %v2495_v50  ;;  %v1799_v52 = vunpack.i.l.bf16 %v2495_v50  ;;  %v1785_v50 = vunpack.i.h.bf16 %v2489_v48 }
 0x10c   :  { %v370_v51 = vsel %vm362_vm8, %v1799_v52, %v1800_v41 }
 0x10d   :  { %v2505_v53 = vpop.permute.xlu0 %348  ;;  %v2507_v54 = vpop.permute.xlu1 %1807  ;;  %v1559_v55 = vpack.c.bf16 %v370_v51, %v364_v17 }
 0x10e   :  { %v1810_v58 = vunpack.i.h.bf16 %v2507_v54  ;;  %v1809_v62 = vunpack.i.l.bf16 %v2507_v54 }
 0x10f   :  { %1560 = vmatprep.subr.bf16.mxu0 %v1559_v55 }
 0x110   :  { %v376_v21 = vsel %vm362_vm8, %v1809_v62, %v1810_v58 }
 0x111   :  { %v1803_v57 = vpop.permute.xlu0 %1802  ;;  %v1818_v59 = vpop.permute.xlu1 %1817 }
 0x112   :  { %v1805_v60 = vunpack.i.h.bf16 %v1803_v57  ;;  %v1804_v61 = vunpack.i.l.bf16 %v1803_v57  ;;  %v1819_v0 = vunpack.i.l.bf16 %v1818_v59  ;;  %v1820_v7 = vunpack.i.h.bf16 %v1818_v59 }
 0x114   :  { %v363_v1 = vsel %vm362_vm8, %v1804_v61, %v1774_v37  ;;  %v369_v3 = vsel %vm362_vm8, %v1805_v60, %v1799_v52  ;;  %v375_v11 = vsel %vm362_vm8, %v1819_v0, %v1809_v62 }
 0x115   :  { %v2513_v5 = vpop.permute.xlu0 %1812  ;;  %v2515_v6 = vpop.permute.xlu1 %1827  ;;  %v1561_v2 = vpack.c.bf16 %v369_v3, %v363_v1 }
 0x116   :  { %v1815_v8 = vunpack.i.h.bf16 %v2513_v5  ;;  %v1814_v9 = vunpack.i.l.bf16 %v2513_v5  ;;  %v1830_v56 = vunpack.i.h.bf16 %v2515_v6  ;;  %v1829_v12 = vunpack.i.l.bf16 %v2515_v6 }
 0x117   :  { %1562 = vmatpush1.bf16.msra.mxu0 %v1561_v2 }
 0x118   :  { %v382_v13 = vsel %vm362_vm8, %v1814_v9, %v1815_v8  ;;  %v381_v14 = vsel %vm362_vm8, %v1820_v7, %v1814_v9  ;;  %v394_v38 = vsel %vm362_vm8, %v1829_v12, %v1830_v56  ;;  %v393_v29 = vsel %vm362_vm8, %v1790_v25, %v1829_v12 }
 0x119   :  { %v2529_v18 = vpop.permute.xlu0 %1822  ;;  %v2531_v20 = vpop.permute.xlu1 %1832  ;;  %v1563_v22 = vpack.c.bf16 %v382_v13, %v376_v21  ;;  %v1565_v24 = vpack.c.bf16 %v381_v14, %v375_v11  ;;  %v1784_v21 = vunpack.i.l.bf16 %v2489_v48 }
 0x11a   :  { %v1825_v63 = vunpack.i.h.bf16 %v2529_v18  ;;  %v1824_v33 = vunpack.i.l.bf16 %v2529_v18  ;;  %v1835_v31 = vunpack.i.h.bf16 %v2531_v20  ;;  %v1834_v35 = vunpack.i.l.bf16 %v2531_v20 }
 0x11b   :  { %1564 = vmatprep.subr.bf16.mxu0 %v1563_v22  ;;  %v368_v54 = vsel %vm362_vm8, %v1784_v21, %v1785_v50  ;;  %v367_v5 = vsel %vm362_vm8, %v1780_v34, %v1784_v21 }
 0x11c   :  { %1566 = vmatpush1.bf16.msra.mxu0 %v1565_v24  ;;  %v388_v36 = vsel %vm362_vm8, %v1824_v33, %v1825_v63  ;;  %v387_v30 = vsel %vm362_vm8, %v1789_v19, %v1824_v33  ;;  %v400_v44 = vsel %vm362_vm8, %v1834_v35, %v1835_v31  ;;  %v399_v37 = vsel %vm362_vm8, %v1794_v32, %v1834_v35 }
 0x11d   :  { %v2549_v39 = vpop.permute.xlu0 %1837  ;;  %v1843_v40 = vpop.permute.xlu1 %1842  ;;  %v1567_v42 = vpack.c.bf16 %v394_v38, %v388_v36  ;;  %v1569_v43 = vpack.c.bf16 %v393_v29, %v387_v30 }
 0x11e   :  { %v1840_v26 = vunpack.i.h.bf16 %v2549_v39  ;;  %v1839_v4 = vunpack.i.l.bf16 %v2549_v39  ;;  %v1845_v16 = vunpack.i.h.bf16 %v1843_v40  ;;  %v1844_v28 = vunpack.i.l.bf16 %v1843_v40 }
 0x11f   :  { %1568 = vmatprep.subr.bf16.mxu0 %v1567_v42 }
 0x120   :  { %1570 = vmatpush1.bf16.msra.mxu0 %v1569_v43  ;;  %v406_v52 = vsel %vm362_vm8, %v1839_v4, %v1840_v26  ;;  %v372_v17 = vsel %vm362_vm8, %v1844_v28, %v1845_v16  ;;  %v405_v51 = vsel %vm362_vm8, %v1795_v10, %v1839_v4  ;;  %v371_v55 = vsel %vm362_vm8, %v1800_v41, %v1844_v28 }
 0x121   :  { %v1853_v57 = vpop.permute.xlu0 %1852  ;;  %v1848_v59 = vpop.permute.xlu1 %1847  ;;  %v1571_v60 = vpack.c.bf16 %v406_v52, %v400_v44  ;;  %v1575_v61 = vpack.c.bf16 %v372_v17, %v366_v23  ;;  %v1573_v45 = vpack.c.bf16 %v405_v51, %v399_v37  ;;  %v1577_v62 = vpack.c.bf16 %v371_v55, %v365_v49 }
 0x122   :  { %v1855_v15 = vunpack.i.h.bf16 %v1853_v57  ;;  %v1854_v0 = vunpack.i.l.bf16 %v1853_v57  ;;  %v1850_v1 = vunpack.i.h.bf16 %v1848_v59  ;;  %v1849_v3 = vunpack.i.l.bf16 %v1848_v59 }
 0x123   :  { %1572 = vmatprep.subr.bf16.mxu0 %v1571_v60  ;;  %1576 = vmatprep.subr.bf16.mxu1 %v1575_v61 }
 0x124   :  { %1574 = vmatpush1.bf16.msra.mxu0 %v1573_v45  ;;  %1578 = vmatpush1.bf16.msra.mxu1 %v1577_v62  ;;  %v378_v11 = vsel %vm362_vm8, %v1854_v0, %v1855_v15  ;;  %v377_v13 = vsel %vm362_vm8, %v1810_v58, %v1854_v0  ;;  %v374_v22 = vsel %vm362_vm8, %v1849_v3, %v1850_v1  ;;  %v2591_v58 = vld [vmem:[%s3163_s2] sm:$0xff] }
 0x125   :  { %v351_v2 = vpop.permute.xlu0 %350  ;;  %v1858_v7 = vpop.permute.xlu1 %1857  ;;  %v373_v24 = vsel %vm362_vm8, %v1845_v16, %v1849_v3  ;;  %v1591_v35 = vpack.c.bf16 %v374_v22, %v368_v54 }
 0x126   :  { %v1860_v9 = vunpack.i.h.bf16 %v1858_v7  ;;  %v1859_v41 = vunpack.i.l.bf16 %v1858_v7  ;;  %v1593_v30 = vpack.c.bf16 %v373_v24, %v367_v5 }
 0x128   :  { %v384_v12 = vsel %vm362_vm8, %v1859_v41, %v1860_v9  ;;  %v383_v14 = vsel %vm362_vm8, %v1815_v8, %v1859_v41  ;;  %v411_v8 = vsel %vm362_vm8, %v2505_v53, %v351_v2 }
 0x129   :  { %v1868_v25 = vpop.permute.xlu0 %1867  ;;  %v2583_v19 = vpop.permute.xlu1 %352  ;;  %v1579_v48 = vpack.c.bf16 %v384_v12, %v378_v11  ;;  %v1581_v33 = vpack.c.bf16 %v383_v14, %v377_v13 }
 0x12a   :  { %v412_v27 = vsel %vm362_vm8, %v351_v2, %v2583_v19  ;;  %v1870_v36 = vunpack.i.h.bf16 %v1868_v25  ;;  %v1869_v38 = vunpack.i.l.bf16 %v1868_v25 }
 0x12b   :  { %491 = vmatprep.subr.mxu0 %v412_v27  ;;  %1580 = vmatprep.subr.bf16.mxu1 %v1579_v48 }
 0x12c   :  { %492 = vmatpush1.msra.mxu0 %v411_v8  ;;  %1582 = vmatpush1.bf16.msra.mxu1 %v1581_v33  ;;  %v385_v53 = vsel %vm362_vm8, %v1860_v9, %v1869_v38  ;;  %v386_v4 = vsel %vm362_vm8, %v1869_v38, %v1870_v36 }
 0x12d   :  { %v1878_v29 = vpop.permute.xlu0 %1877  ;;  %v1863_v10 = vpop.permute.xlu1 %1862  ;;  %1592 = vmatprep.subr.bf16.mxu0 %v1591_v35  ;;  %1553 = vmatmul.mubr.msk.f32.vlgmr.msra.gmra.mrb[0].mxu0 %vm471_vm9, %v2591_v58 }
 0x12e   :  { %v1865_v46 = vunpack.i.h.bf16 %v1863_v10  ;;  %v1864_v32 = vunpack.i.l.bf16 %v1863_v10  ;;  %1594 = vmatpush1.bf16.msra.mxu0 %v1593_v30  ;;  %681 = vmatprep.mubr.f32.mxu0 %v2171_v47  ;;  %v1880_v34 = vunpack.i.h.bf16 %v1878_v29  ;;  %v1879_v40 = vunpack.i.l.bf16 %v1878_v29 }
 0x130   :  { %v379_v42 = vsel %vm362_vm8, %v1855_v15, %v1864_v32  ;;  %v380_v43 = vsel %vm362_vm8, %v1864_v32, %v1865_v46  ;;  %v396_v52 = vsel %vm362_vm8, %v1879_v40, %v1880_v34  ;;  %v395_v17 = vsel %vm362_vm8, %v1830_v56, %v1879_v40 }
 0x131   :  { %v1888_v16 = vpop.permute.xlu0 %1887  ;;  %v1873_v28 = vpop.permute.xlu1 %1872  ;;  %v1595_v44 = vpack.c.bf16 %v386_v4, %v380_v43  ;;  %v1597_v23 = vpack.c.bf16 %v385_v53, %v379_v42  ;;  %v691_v40 = vlaneseq  ;;  %v35_v43 = vld [vmem:[%s3164_s1] sm:$0x3f] }
 0x132   :  { %v1875_v37 = vunpack.i.h.bf16 %v1873_v28  ;;  %v1874_v49 = vunpack.i.l.bf16 %v1873_v28  ;;  %v1890_v51 = vunpack.i.h.bf16 %v1888_v16  ;;  %v1889_v55 = vunpack.i.l.bf16 %v1888_v16 }
 0x133   :  { %1596 = vmatprep.subr.bf16.mxu0 %v1595_v44  ;;  %v692_v53 = vshrl.u32 %v691_v40, 7 }
 0x134   :  { %1598 = vmatpush1.bf16.msra.mxu0 %v1597_v23  ;;  %v390_v57 = vsel %vm362_vm8, %v1874_v49, %v1875_v37  ;;  %v389_v59 = vsel %vm362_vm8, %v1825_v63, %v1874_v49  ;;  %v397_v6 = vsel %vm362_vm8, %v1880_v34, %v1889_v55  ;;  %v398_v18 = vsel %vm362_vm8, %v1889_v55, %v1890_v51 }
 0x135   :  { %v1898_v60 = vpop.permute.xlu0 %1897  ;;  %v1883_v61 = vpop.permute.xlu1 %1882  ;;  %v1583_v45 = vpack.c.bf16 %v396_v52, %v390_v57  ;;  %v1585_v62 = vpack.c.bf16 %v395_v17, %v389_v59  ;;  %v693_v42 = vsub.s32 0, %v692_v53  ;;  %v697_v4 = vsub.s32 1, %v692_v53 }
 0x136   :  { %v1885_v15 = vunpack.i.h.bf16 %v1883_v61  ;;  %v1884_v0 = vunpack.i.l.bf16 %v1883_v61  ;;  %v1900_v1 = vunpack.i.h.bf16 %v1898_v60  ;;  %v1899_v3 = vunpack.i.l.bf16 %v1898_v60 }
 0x137   :  { %1584 = vmatprep.subr.bf16.mxu1 %v1583_v45  ;;  %v2643_v28 = vrot.slane %v35_v43, %v693_v42  ;;  %v705_v49 = vsub.s32 3, %v692_v53  ;;  %v709_v55 = vsub.s32 4, %v692_v53  ;;  %v713_v60 = vsub.s32 5, %v692_v53  ;;  %v688_v42 = vld [vmem:[%s3165_s4] sm:$0xff] }
 0x138   :  { %v391_v56 = vsel %vm362_vm8, %v1875_v37, %v1884_v0  ;;  %1586 = vmatpush1.bf16.msra.mxu1 %v1585_v62  ;;  %v392_v2 = vsel %vm362_vm8, %v1884_v0, %v1885_v15  ;;  %v408_v11 = vsel %vm362_vm8, %v1899_v3, %v1900_v1  ;;  %v407_v12 = vsel %vm362_vm8, %v1840_v26, %v1899_v3 }
 0x139   :  { %v1601_v7 = vpack.c.bf16 %v397_v6, %v391_v56  ;;  %v1908_v63 = vpop.permute.xlu0 %1907  ;;  %v1893_v50 = vpop.permute.xlu1 %1892  ;;  %v1599_v9 = vpack.c.bf16 %v398_v18, %v392_v2  ;;  %v701_v37 = vsub.s32 2, %v692_v53  ;;  %v2657_v59 = vrot.slane %v35_v43, %v705_v49 }
 0x13a   :  { %v1895_v41 = vunpack.i.h.bf16 %v1893_v50  ;;  %v1894_v21 = vunpack.i.l.bf16 %v1893_v50  ;;  %v1910_v13 = vunpack.i.h.bf16 %v1908_v63  ;;  %v1909_v14 = vunpack.i.l.bf16 %v1908_v63 }
 0x13b   :  { %1600 = vmatprep.subr.bf16.mxu0 %v1599_v9  ;;  %v2655_v51 = vrot.slane %v35_v43, %v701_v37  ;;  %v2669_v56 = vrot.slane %v35_v43, %v713_v60 }
 0x13c   :  { %1602 = vmatpush1.bf16.msra.mxu0 %v1601_v7  ;;  %v402_v22 = vsel %vm362_vm8, %v1894_v21, %v1895_v41  ;;  %v401_v24 = vsel %vm362_vm8, %v1835_v31, %v1894_v21  ;;  %v409_v39 = vsel %vm362_vm8, %v1900_v1, %v1909_v14  ;;  %v410_v35 = vsel %vm362_vm8, %v1909_v14, %v1910_v13 }
 0x13d   :  { %v1903_v25 = vpop.permute.xlu1 %1902  ;;  %v1587_v48 = vpack.c.bf16 %v408_v11, %v402_v22  ;;  %v1589_v33 = vpack.c.bf16 %v407_v12, %v401_v24  ;;  %v357_v27 = vpop.permute.xlu0 %356  ;;  %v2665_v1 = vrot.slane %v35_v43, %v709_v55 }
 0x13e   :  { %v1905_v54 = vunpack.i.h.bf16 %v1903_v25  ;;  %v1904_v5 = vunpack.i.l.bf16 %v1903_v25 }
 0x13f   :  { %1588 = vmatprep.subr.bf16.mxu1 %v1587_v48 }
 0x140   :  { %v403_v26 = vsel %vm362_vm8, %v1895_v41, %v1904_v5  ;;  %1590 = vmatpush1.bf16.msra.mxu1 %v1589_v33  ;;  %v404_v8 = vsel %vm362_vm8, %v1904_v5, %v1905_v54 }
 0x141   :  { %v1605_v36 = vpack.c.bf16 %v409_v39, %v403_v26  ;;  %v355_v20 = vpop.permute.xlu1 %354  ;;  %v1603_v38 = vpack.c.bf16 %v410_v35, %v404_v8  ;;  %v361_v29 = vpop.permute.xlu0 %360 }
 0x142   :  { %v414_v31 = vsel %vm362_vm8, %v355_v20, %v357_v27  ;;  %v413_v30 = vsel %vm362_vm8, %v2583_v19, %v355_v20 }
 0x143   :  { %562 = vmatprep.subr.mxu1 %v414_v31  ;;  %1604 = vmatprep.subr.bf16.mxu0 %v1603_v38 }
 0x144   :  { %563 = vmatpush1.msra.mxu1 %v413_v30  ;;  %1606 = vmatpush1.bf16.msra.mxu0 %v1605_v36 }
 0x145   :  { %v359_v10 = vpop.permute.xlu1 %358  ;;  %1554 = vmatmul.mubr.msk.f32.vlgmr.msra.gmra.mrb[0].mxu1 %vm471_vm9, %v2591_v58 }
 0x146   :  { %v415_v46 = vsel %vm362_vm8, %v357_v27, %v359_v10  ;;  %v416_v32 = vsel %vm362_vm8, %v359_v10, %v361_v29  ;;  %1301 = vmatprep.mubr.f32.mxu1 %v2171_v47 }
 0x147   :  { %633 = vmatprep.subr.mxu0 %v416_v32 }
 0x148   :  { %634 = vmatpush1.msra.mxu0 %v415_v46 }
 0x149   :  { %1555 = vmatmul.mubr.msk.f32.vlgmr.msra.gmra.mrb[2].mxu0 %vm471_vm9, %v2591_v58  ;;  %v2649_v58 = vrot.slane %v35_v43, %v697_v4 }
 0x14a   :  { %1372 = vmatprep.mubr.f32.mxu0 %v2171_v47 }
 0x156   :  { %v234_v16 = vpop.permute.xlu1 %233 }
 0x200   :  { %v541_v19 = vpop.f32.mrb[0].mxu0 }
 0x201   :  { %v543_v34 = vpop.f32.mrb[1].mxu0  ;;  %v2645_v44 = vadd.f32 %v541_v19, %v234_v16 }
 0x202   :  { %v2647_v23 = vadd.f32 %v543_v34, %v234_v16 }
 0x203   :  { %v721_v52 = vmul.f32 %v2643_v28, %v2645_v44 }
 0x204   :  { %v722_v17 = vmul.f32 %v2649_v58, %v2647_v23 }
 0x206   :  { %v727_v15 = vadd.f32 %v722_v17, %v721_v52 }
 0x218   :  { %v612_v57 = vpop.f32.mrb[0].mxu1 }
 0x219   :  { %v2659_v61 = vadd.f32 %v612_v57, %v234_v16  ;;  %v614_v45 = vpop.f32.mrb[1].mxu1 }
 0x21a   :  { %v2661_v62 = vadd.f32 %v614_v45, %v234_v16 }
 0x21b   :  { %v723_v0 = vmul.f32 %v2655_v51, %v2659_v61 }
 0x21c   :  { %v724_v3 = vmul.f32 %v2657_v59, %v2661_v62  ;;  %v683_v6 = vpop.f32.mrb[2].mxu0 }
 0x21d   :  { %v728_v2 = vadd.f32 %v727_v15, %v723_v0  ;;  %v2671_v18 = vadd.f32 %v683_v6, %v234_v16  ;;  %v685_v7 = vpop.f32.mrb[3].mxu0 }
 0x21e   :  { %v2673_v63 = vadd.f32 %v685_v7, %v234_v16  ;;  %v689_v16 = vld [vmem:[%s3166_s5] sm:$0xff] }
 0x21f   :  { %v725_v50 = vmul.f32 %v2665_v1, %v2671_v18  ;;  %v729_v9 = vadd.f32 %v728_v2, %v724_v3 }
 0x220   :  { %v726_v41 = vmul.f32 %v2669_v56, %v2673_v63 }
 0x221   :  { %v730_v21 = vadd.f32 %v729_v9, %v725_v50 }
 0x223   :  { %v731_v11 = vadd.f32 %v730_v21, %v726_v41 }
 0x225   :  { %732 = vadd.xlane.f32.xlu0 %v731_v11 }
 0x2b2   :  { %v733_v12 = vpop.xlane.xlu0 %732 }
 0x2b3   :  { %v734_v13 = vmul.f32 0.001953125, %v733_v12 }
 0x2b5   :  { %v735_v14 = vsub.f32 %v2645_v44, %v734_v13  ;;  %v736_v22 = vsub.f32 %v2647_v23, %v734_v13  ;;  %v737_v24 = vsub.f32 %v2659_v61, %v734_v13  ;;  %v738_v25 = vsub.f32 %v2661_v62, %v734_v13 }
 0x2b6   :  { %v739_v48 = vsub.f32 %v2671_v18, %v734_v13  ;;  %v740_v5 = vsub.f32 %v2673_v63, %v734_v13 }
 0x2b7   :  { %v741_v33 = vmul.f32 %v735_v14, %v2643_v28  ;;  %v742_v27 = vmul.f32 %v736_v22, %v2649_v58  ;;  %v743_v54 = vmul.f32 %v737_v24, %v2655_v51  ;;  %v744_v39 = vmul.f32 %v738_v25, %v2657_v59 }
 0x2b8   :  { %v745_v35 = vmul.f32 %v739_v48, %v2665_v1  ;;  %v746_v38 = vmul.f32 %v740_v5, %v2669_v56 }
 0x2b9   :  { %v747_v26 = vmul.f32 %v741_v33, %v741_v33  ;;  %v748_v8 = vmul.f32 %v742_v27, %v742_v27  ;;  %v749_v36 = vmul.f32 %v743_v54, %v743_v54  ;;  %v750_v31 = vmul.f32 %v744_v39, %v744_v39 }
 0x2ba   :  { %v751_v29 = vmul.f32 %v745_v35, %v745_v35  ;;  %v752_v46 = vmul.f32 %v746_v38, %v746_v38 }
 0x2bb   :  { %v753_v20 = vadd.f32 %v748_v8, %v747_v26 }
 0x2bd   :  { %v754_v30 = vadd.f32 %v753_v20, %v749_v36 }
 0x2bf   :  { %v755_v10 = vadd.f32 %v754_v30, %v750_v31 }
 0x2c1   :  { %v756_v32 = vadd.f32 %v755_v10, %v751_v29 }
 0x2c3   :  { %v757_v19 = vadd.f32 %v756_v32, %v752_v46 }
 0x2c5   :  { %758 = vadd.xlane.f32.xlu1 %v757_v19 }
 0x352   :  { %v759_v34 = vpop.xlane.xlu1 %758 }
 0x353   :  { %v760_v40 = vmul.f32 0.001953125, %v759_v34 }
 0x355   :  { %v761_v53 = vadd.f32 1e-05, %v760_v40 }
 0x357   :  { %2158 = vrsqrt.f32 %v761_v53 }
 0x361   :  { %v2159_v43 = vpop.eup %2158 }
 0x362   :  { %v763_v4 = vmul.f32 %v2159_v43, %v688_v42 }
 0x364   :  { %768 = vperm.xlu0 %1912, %v763_v4   ;;  %v764_v37 = vmul.f32 %v763_v4, %v734_v13 }
 0x366   :  { %v765_v49 = vsub.f32 %v689_v16, %v764_v37 }
 0x368   :  { %779 = vperm.xlu1 %1911, %v765_v49   ;;  %945 = vrot.lane.b32.xlu0 %v2171_v47, %s2167_s28 }
 0x36c   :  { %925 = vrot.lane.b32.xlu1 %v2171_v47, %s2166_s27 }
 0x370   :  { %965 = vrot.lane.b32.xlu1 %v2171_v47, %s2168_s11 }
 0x374   :  { %985 = vrot.lane.b32.xlu1 %v2171_v47, %s2169_s14 }
 0x3e3   :  { %v769_v52 = vpop.permute.xlu0 %768 }
 0x3e4   :  { %v771_v17 = vmul.f32 %v769_v52, %v2645_v44  ;;  %v772_v55 = vmul.f32 %v769_v52, %v2647_v23  ;;  %v773_v57 = vmul.f32 %v769_v52, %v2659_v61  ;;  %v774_v44 = vmul.f32 %v769_v52, %v2661_v62 }
 0x3e5   :  { %v775_v23 = vmul.f32 %v769_v52, %v2671_v18  ;;  %v776_v22 = vmul.f32 %v769_v52, %v2673_v63 }
 0x3e7   :  { %v780_v60 = vpop.permute.xlu1 %779  ;;  %v2755_v5 = vpop.permute.xlu0 %945 }
 0x3e8   :  { %v782_v45 = vadd.f32 %v780_v60, %v771_v17  ;;  %v783_v15 = vadd.f32 %v780_v60, %v772_v55  ;;  %v784_v0 = vadd.f32 %v780_v60, %v773_v57  ;;  %v785_v61 = vadd.f32 %v780_v60, %v774_v44 }
 0x3e9   :  { %v786_v21 = vadd.f32 %v780_v60, %v775_v23  ;;  %v787_v24 = vadd.f32 %v780_v60, %v776_v22 }
 0x3ea   :  { %v788_v3 = vmax.f32 %v782_v45, 0.0  ;;  %v789_v6 = vmax.f32 %v783_v15, 0.0  ;;  %v790_v2 = vmax.f32 %v784_v0, 0.0  ;;  %v791_v12 = vmax.f32 %v785_v61, 0.0 }
 0x3eb   :  { %v792_v13 = vmax.f32 %v786_v21, 0.0  ;;  %v793_v48 = vmax.f32 %v787_v24, 0.0  ;;  %v2751_v27 = vpop.permute.xlu1 %925 }
 0x3ec   :  { %v794_v7 = vmul.f32 %v788_v3, %v2643_v28  ;;  %v795_v50 = vmul.f32 %v789_v6, %v2649_v58  ;;  %v796_v9 = vmul.f32 %v790_v2, %v2655_v51  ;;  %v797_v62 = vmul.f32 %v791_v12, %v2657_v59 }
 0x3ed   :  { %v798_v18 = vmul.f32 %v792_v13, %v2665_v1  ;;  %v799_v33 = vmul.f32 %v793_v48, %v2669_v56 }
 0x3ee   :  { %v1943_v41 = vpack.i.bf16 %v795_v50, %v794_v7  ;;  %v1918_v11 = vpack.i.bf16 %v2171_v47, %v796_v9  ;;  %v1948_v25 = vpack.i.bf16 %v797_v62, %v796_v9 }
 0x3ef   :  { %v1983_v14 = vpack.i.bf16 %v798_v18, %v797_v62  ;;  %v2003_v63 = vpack.i.bf16 %v799_v33, %v798_v18  ;;  %v2753_v54 = vpop.permute.xlu1 %965 }
 0x3f0   :  { %1944 = vrot.lane.b32.xlu0 %v1943_v41, %s2165_s26  ;;  %1914 = vrot.lane.b32.xlu1 %v1943_v41, %s2163_s22 }
 0x3f3   :  { %v2757_v39 = vpop.permute.xlu1 %985 }
 0x3f4   :  { %1954 = vrot.lane.b32.xlu0 %v1943_v41, %s2166_s27  ;;  %1919 = vrot.lane.b32.xlu1 %v1918_v11, %s2163_s22 }
 0x3f8   :  { %1964 = vrot.lane.b32.xlu0 %v1943_v41, %s2167_s28  ;;  %1924 = vrot.lane.b32.xlu1 %v1943_v41, %s2162_s21 }
 0x3fc   :  { %1974 = vrot.lane.b32.xlu0 %v1943_v41, %s2168_s11  ;;  %1929 = vrot.lane.b32.xlu1 %v1918_v11, %s2162_s21 }
 0x400   :  { %1984 = vrot.lane.b32.xlu0 %v1983_v14, %s2163_s22  ;;  %1934 = vrot.lane.b32.xlu1 %v1943_v41, %s2164_s25 }
 0x404   :  { %1989 = vrot.lane.b32.xlu0 %v1983_v14, %s2162_s21  ;;  %1939 = vrot.lane.b32.xlu1 %v1918_v11, %s2164_s25 }
 0x408   :  { %973 = vrot.lane.b32.xlu0 %v794_v7, %s2169_s14  ;;  %1949 = vrot.lane.b32.xlu1 %v1948_v25, %s2165_s26 }
 0x40c   :  { %977 = vrot.lane.b32.xlu0 %v796_v9, %s2169_s14  ;;  %1959 = vrot.lane.b32.xlu1 %v1948_v25, %s2166_s27 }
 0x410   :  { %881 = vrot.lane.b32.xlu0 %v799_v33, %s2164_s25  ;;  %1969 = vrot.lane.b32.xlu1 %v1948_v25, %s2167_s28 }
 0x414   :  { %2004 = vrot.lane.b32.xlu0 %v2003_v63, %s2166_s27  ;;  %1979 = vrot.lane.b32.xlu1 %v1948_v25, %s2168_s11 }
 0x418   :  { %2009 = vrot.lane.b32.xlu0 %v2003_v63, %s2167_s28  ;;  %841 = vrot.lane.b32.xlu1 %v799_v33, %s2163_s22 }
 0x41c   :  { %979 = vrot.lane.b32.xlu0 %v797_v62, %s2169_s14  ;;  %1994 = vrot.lane.b32.xlu1 %v1983_v14, %s2164_s25 }
 0x420   :  { %983 = vrot.lane.b32.xlu0 %v799_v33, %s2169_s14  ;;  %975 = vrot.lane.b32.xlu1 %v795_v50, %s2169_s14 }
 0x424   :  { %2019 = vrot.lane.b32.xlu0 %v1943_v41, %s2170_s17  ;;  %861 = vrot.lane.b32.xlu1 %v799_v33, %s2162_s21 }
 0x428   :  { %2024 = vrot.lane.b32.xlu0 %v1948_v25, %s2170_s17  ;;  %1999 = vrot.lane.b32.xlu1 %v2003_v63, %s2165_s26 }
 0x42c   :  { %2029 = vrot.lane.b32.xlu0 %v2003_v63, %s2170_s17  ;;  %2014 = vrot.lane.b32.xlu1 %v2003_v63, %s2168_s11 }
 0x430   :  { %981 = vrot.lane.b32.xlu1 %v798_v18, %s2169_s14 }
 0x462   :  { %v2759_v26 = vpop.permute.xlu0 %1944  ;;  %v1915_v8 = vpop.permute.xlu1 %1914 }
 0x463   :  { %v1946_v20 = vunpack.i.l.bf16 %v2759_v26  ;;  %v1917_v40 = vunpack.i.h.bf16 %v1915_v8  ;;  %v1916_v53 = vunpack.i.l.bf16 %v1915_v8  ;;  %v1947_v24 = vunpack.i.h.bf16 %v2759_v26 }
 0x465   :  { %v844_v49 = vsel %vm71_vm0, %v1916_v53, %v1917_v40 }
 0x466   :  { %v1955_v35 = vpop.permute.xlu0 %1954  ;;  %v2761_v36 = vpop.permute.xlu1 %1919 }
 0x467   :  { %v1956_v38 = vunpack.i.l.bf16 %v1955_v35  ;;  %v1921_v10 = vunpack.i.l.bf16 %v2761_v36  ;;  %v1922_v57 = vunpack.i.h.bf16 %v2761_v36  ;;  %v1957_v11 = vunpack.i.h.bf16 %v1955_v35 }
 0x469   :  { %v2033_v31 = vpack.i.bf16 %v1956_v38, %v1946_v20  ;;  %v845_v43 = vsel %vm71_vm0, %v1917_v40, %v1921_v10  ;;  %v843_v50 = vsel %vm71_vm0, %v1922_v57, %v1916_v53  ;;  %v927_v48 = vsel %vm159_vm3, %v1956_v38, %v1957_v11 }
 0x46a   :  { %v2766_v30 = vpop.permute.xlu0 %1964  ;;  %v1925_v29 = vpop.permute.xlu1 %1924  ;;  %v2043_v55 = vpack.i.bf16 %v845_v43, %v844_v49  ;;  %v2048_v12 = vpack.i.bf16 %v843_v50, %v2171_v47 }
 0x46b   :  { %2034 = vrot.lane.b32.xlu0 %v2033_v31, %s2170_s17  ;;  %v1966_v19 = vunpack.i.l.bf16 %v2766_v30  ;;  %v1927_v52 = vunpack.i.h.bf16 %v1925_v29  ;;  %v1926_v17 = vunpack.i.l.bf16 %v1925_v29  ;;  %v1967_v33 = vunpack.i.h.bf16 %v2766_v30 }
 0x46c   :  { %v901_v30 = vsel %vm132_vm4, %v1946_v20, %v1947_v24 }
 0x46d   :  { %v864_v3 = vsel %vm92_vm1, %v1926_v17, %v1927_v52  ;;  %v947_v43 = vsel %vm180_vm5, %v1966_v19, %v1967_v33 }
 0x46e   :  { %v2770_v46 = vpop.permute.xlu0 %1974  ;;  %v2772_v32 = vpop.permute.xlu1 %1929 }
 0x46f   :  { %v1976_v34 = vunpack.i.l.bf16 %v2770_v46  ;;  %v1931_v4 = vunpack.i.l.bf16 %v2772_v32  ;;  %v1932_v6 = vunpack.i.h.bf16 %v2772_v32 }
 0x471   :  { %v2038_v42 = vpack.i.bf16 %v1976_v34, %v1966_v19  ;;  %v865_v60 = vsel %vm92_vm1, %v1927_v52, %v1931_v4  ;;  %v863_v61 = vsel %vm92_vm1, %v1932_v6, %v1926_v17 }
 0x472   :  { %v2782_v16 = vpop.permute.xlu0 %1984  ;;  %v1935_v37 = vpop.permute.xlu1 %1934  ;;  %v2053_v7 = vpack.i.bf16 %v865_v60, %v864_v3 }
 0x473   :  { %2039 = vrot.lane.b32.xlu1 %v2038_v42, %s2170_s17  ;;  %v1936_v2 = vunpack.i.l.bf16 %v1935_v37  ;;  %v1937_v21 = vunpack.i.h.bf16 %v1935_v37  ;;  %v1986_v35 = vunpack.i.l.bf16 %v2782_v16  ;;  %v1987_v53 = vunpack.i.h.bf16 %v2782_v16 }
 0x474   :  { %v1977_v37 = vunpack.i.h.bf16 %v2770_v46 }
 0x475   :  { %v884_v25 = vsel %vm113_vm2, %v1936_v2, %v1937_v21  ;;  %v846_v52 = vsel %vm71_vm0, %v1921_v10, %v1986_v35  ;;  %v847_v20 = vsel %vm71_vm0, %v1986_v35, %v1987_v53 }
 0x476   :  { %v2790_v45 = vpop.permute.xlu0 %1989  ;;  %v2792_v15 = vpop.permute.xlu1 %1939  ;;  %v967_v36 = vsel %vm201_vm6, %v1976_v34, %v1977_v37  ;;  %v2088_v60 = vpack.i.bf16 %v847_v20, %v846_v52 }
 0x477   :  { %v1942_v0 = vunpack.i.h.bf16 %v2792_v15  ;;  %2044 = vrot.lane.b32.xlu1 %v2043_v55, %s2170_s17  ;;  %v1941_v9 = vunpack.i.l.bf16 %v2792_v15  ;;  %v1992_v55 = vunpack.i.h.bf16 %v2790_v45  ;;  %v1991_v19 = vunpack.i.l.bf16 %v2790_v45 }
 0x479   :  { %v883_v41 = vsel %vm113_vm2, %v1942_v0, %v1936_v2  ;;  %v885_v62 = vsel %vm113_vm2, %v1937_v21, %v1941_v9  ;;  %v866_v45 = vsel %vm92_vm1, %v1931_v4, %v1991_v19  ;;  %v867_v2 = vsel %vm92_vm1, %v1991_v19, %v1992_v55 }
 0x47a   :  { %v2801_v44 = vpop.permute.xlu0 %973  ;;  %v2803_v23 = vpop.permute.xlu1 %1949  ;;  %v2063_v13 = vpack.i.bf16 %v883_v41, %v863_v61  ;;  %v2058_v63 = vpack.i.bf16 %v885_v62, %v884_v25  ;;  %v2098_v46 = vpack.i.bf16 %v867_v2, %v866_v45 }
 0x47b   :  { %1112 = vrot.lane.b32.xlu0 %v2801_v44, %s2170_s17  ;;  %2054 = vrot.lane.b32.xlu1 %v2053_v7, %s2170_s17  ;;  %v1951_v18 = vunpack.i.l.bf16 %v2803_v23 }
 0x47d   :  { %v902_v31 = vsel %vm132_vm4, %v1947_v24, %v1951_v18 }
 0x47e   :  { %v2814_v14 = vpop.permute.xlu1 %1959  ;;  %v2838_v42 = vpop.permute.xlu0 %977  ;;  %v2068_v49 = vpack.i.bf16 %v902_v31, %v901_v30 }
 0x47f   :  { %v1961_v22 = vunpack.i.l.bf16 %v2814_v14  ;;  %2064 = vrot.lane.b32.xlu1 %v2063_v13, %s2170_s17  ;;  %2049 = vrot.lane.b32.xlu0 %v2048_v12, %s2170_s17  ;;  %v1962_v25 = vunpack.i.h.bf16 %v2814_v14 }
 0x481   :  { %v928_v8 = vsel %vm159_vm3, %v1957_v11, %v1961_v22  ;;  %v929_v35 = vsel %vm159_vm3, %v1961_v22, %v1962_v25 }
 0x482   :  { %v2073_v29 = vpack.i.bf16 %v928_v8, %v927_v48  ;;  %v2830_v40 = vpop.permute.xlu1 %1969  ;;  %v882_v0 = vpop.permute.xlu0 %881 }
 0x483   :  { %v1971_v38 = vunpack.i.l.bf16 %v2830_v40  ;;  %2059 = vrot.lane.b32.xlu0 %v2058_v63, %s2170_s17 }
 0x484   :  { %2074 = vrot.lane.b32.xlu1 %v2073_v29, %s2170_s17 }
 0x485   :  { %v948_v16 = vsel %vm180_vm5, %v1967_v33, %v1971_v38 }
 0x486   :  { %v2078_v26 = vpack.i.bf16 %v948_v16, %v947_v43  ;;  %v2849_v17 = vpop.permute.xlu1 %1979  ;;  %v2005_v21 = vpop.permute.xlu0 %2004 }
 0x487   :  { %v1981_v57 = vunpack.i.l.bf16 %v2849_v17  ;;  %2069 = vrot.lane.b32.xlu0 %v2068_v49, %s2170_s17  ;;  %v2006_v13 = vunpack.i.l.bf16 %v2005_v21  ;;  %v2007_v33 = vunpack.i.h.bf16 %v2005_v21  ;;  %v1982_v22 = vunpack.i.h.bf16 %v2849_v17 }
 0x488   :  { %2079 = vrot.lane.b32.xlu1 %v2078_v26, %s2170_s17 }
 0x489   :  { %v968_v10 = vsel %vm201_vm6, %v1977_v37, %v1981_v57  ;;  %v931_v30 = vsel %vm159_vm3, %v2006_v13, %v2007_v33  ;;  %v932_v43 = vsel %vm159_vm3, %v2007_v33, %v2751_v27 }
 0x48a   :  { %v2083_v3 = vpack.i.bf16 %v968_v10, %v967_v36  ;;  %v842_v6 = vpop.permute.xlu1 %841  ;;  %v2010_v16 = vpop.permute.xlu0 %2009  ;;  %v2133_v26 = vpack.i.bf16 %v932_v43, %v931_v30 }
 0x48b   :  { %v848_v7 = vsel %vm71_vm0, %v1987_v53, %v842_v6  ;;  %v2011_v19 = vunpack.i.l.bf16 %v2010_v16 }
 0x48c   :  { %2089 = vrot.lane.b32.xlu1 %v2088_v60, %s2170_s17  ;;  %2084 = vrot.lane.b32.xlu0 %v2083_v3, %s2170_s17  ;;  %v2093_v34 = vpack.i.bf16 %v842_v6, %v848_v7  ;;  %v2012_v6 = vunpack.i.h.bf16 %v2010_v16 }
 0x48e   :  { %v1995_v50 = vpop.permute.xlu1 %1994 }
 0x48f   :  { %v1997_v41 = vunpack.i.h.bf16 %v1995_v50  ;;  %v1996_v61 = vunpack.i.l.bf16 %v1995_v50  ;;  %v952_v50 = vsel %vm180_vm5, %v2012_v6, %v2755_v5 }
 0x490   :  { %2094 = vrot.lane.b32.xlu1 %v2093_v34, %s2170_s17  ;;  %2099 = vrot.lane.b32.xlu0 %v2098_v46, %s2170_s17  ;;  %v980_v46 = vpop.permute.xlu0 %979 }
 0x491   :  { %v886_v32 = vsel %vm113_vm2, %v1941_v9, %v1996_v61  ;;  %v887_v4 = vsel %vm113_vm2, %v1996_v61, %v1997_v41  ;;  %v888_v62 = vsel %vm113_vm2, %v1997_v41, %v882_v0  ;;  %v930_v9 = vsel %vm159_vm3, %v1962_v25, %v2006_v13 }
 0x492   :  { %v2103_v11 = vpack.i.bf16 %v887_v4, %v886_v32  ;;  %v976_v12 = vpop.permute.xlu1 %975  ;;  %v2113_v48 = vpack.i.bf16 %v882_v0, %v888_v62  ;;  %v2123_v31 = vpack.i.bf16 %v930_v9, %v929_v35  ;;  %v951_v41 = vsel %vm180_vm5, %v2011_v19, %v2012_v6  ;;  %v994_v4 = vld [vmem:[%s3167_s7] sm:$0xff] }
 0x493   :  { %v987_v24 = vsel %vm222_vm7, %v2801_v44, %v976_v12  ;;  %v988_v63 = vsel %vm222_vm7, %v976_v12, %v2838_v42  ;;  %v1952_v44 = vunpack.i.h.bf16 %v2803_v23  ;;  %v1972_v23 = vunpack.i.h.bf16 %v2830_v40 }
 0x494   :  { %2104 = vrot.lane.b32.xlu1 %v2103_v11, %s2170_s17  ;;  %1114 = vrot.lane.b32.xlu0 %v987_v24, %s2170_s17  ;;  %v984_v32 = vpop.permute.xlu0 %983  ;;  %v989_v40 = vsel %vm222_vm7, %v2838_v42, %v980_v46 }
 0x495   :  { %v903_v14 = vsel %vm132_vm4, %v1951_v18, %v1952_v44  ;;  %v969_v18 = vsel %vm201_vm6, %v1981_v57, %v1982_v22  ;;  %v950_v45 = vsel %vm180_vm5, %v1972_v23, %v2011_v19  ;;  %v949_v17 = vsel %vm180_vm5, %v1971_v38, %v1972_v23 }
 0x496   :  { %v862_v15 = vpop.permute.xlu1 %861  ;;  %v2138_v57 = vpack.i.bf16 %v950_v45, %v949_v17  ;;  %v992_v5 = vsel %vm222_vm7, %v984_v32, %v2757_v39 }
 0x497   :  { %v868_v8 = vsel %vm92_vm1, %v1992_v55, %v862_v15 }
 0x498   :  { %1116 = vrot.lane.b32.xlu1 %v988_v63, %s2170_s17  ;;  %2114 = vrot.lane.b32.xlu0 %v2113_v48, %s2170_s17  ;;  %v2108_v29 = vpack.i.bf16 %v862_v15, %v868_v8  ;;  %v2938_v11 = vpop.permute.xlu0 %2019 }
 0x499   :  { %v2022_v13 = vunpack.i.h.bf16 %v2938_v11  ;;  %v2021_v62 = vunpack.i.l.bf16 %v2938_v11 }
 0x49a   :  { %v2000_v53 = vpop.permute.xlu1 %1999 }
 0x49b   :  { %v2002_v37 = vunpack.i.h.bf16 %v2000_v53  ;;  %v2001_v49 = vunpack.i.l.bf16 %v2000_v53  ;;  %v1127_v33 = vsel %vm362_vm8, %v2021_v62, %v2022_v13 }
 0x49c   :  { %2109 = vrot.lane.b32.xlu1 %v2108_v29, %s2170_s17  ;;  %2124 = vrot.lane.b32.xlu0 %v2123_v31, %s2170_s17  ;;  %v2940_v12 = vpop.permute.xlu0 %2024 }
 0x49d   :  { %v904_v52 = vsel %vm132_vm4, %v1952_v44, %v2001_v49  ;;  %v905_v27 = vsel %vm132_vm4, %v2001_v49, %v2002_v37 }
 0x49e   :  { %v2118_v20 = vpack.i.bf16 %v904_v52, %v903_v14  ;;  %v2015_v55 = vpop.permute.xlu1 %2014  ;;  %v2128_v0 = vpack.i.bf16 %v2002_v37, %v905_v27 }
 0x49f   :  { %v2017_v36 = vunpack.i.h.bf16 %v2015_v55  ;;  %v2016_v10 = vunpack.i.l.bf16 %v2015_v55 }
 0x4a0   :  { %2119 = vrot.lane.b32.xlu1 %v2118_v20, %s2170_s17  ;;  %2134 = vrot.lane.b32.xlu0 %v2133_v26, %s2170_s17  ;;  %v2942_v42 = vpop.permute.xlu0 %2029 }
 0x4a1   :  { %v970_v60 = vsel %vm201_vm6, %v1982_v22, %v2016_v10  ;;  %v972_v2 = vsel %vm201_vm6, %v2017_v36, %v2753_v54  ;;  %v971_v7 = vsel %vm201_vm6, %v2016_v10, %v2017_v36  ;;  %v2148_v54 = vpack.i.bf16 %v952_v50, %v951_v41 }
 0x4a2   :  { %v2143_v3 = vpack.i.bf16 %v970_v60, %v969_v18  ;;  %v2153_v34 = vpack.i.bf16 %v972_v2, %v971_v7  ;;  %v982_v61 = vpop.permute.xlu1 %981 }
 0x4a3   :  { %v990_v21 = vsel %vm222_vm7, %v980_v46, %v982_v61  ;;  %v991_v38 = vsel %vm222_vm7, %v982_v61, %v984_v32  ;;  %v2026_v46 = vunpack.i.l.bf16 %v2940_v12 }
 0x4a4   :  { %2129 = vrot.lane.b32.xlu1 %v2128_v0, %s2170_s17  ;;  %2144 = vrot.lane.b32.xlu0 %v2143_v3, %s2170_s17 }
 0x4a8   :  { %2139 = vrot.lane.b32.xlu1 %v2138_v57, %s2170_s17  ;;  %2154 = vrot.lane.b32.xlu0 %v2153_v34, %s2170_s17  ;;  %v2027_v57 = vunpack.i.h.bf16 %v2940_v12 }
 0x4ac   :  { %2149 = vrot.lane.b32.xlu1 %v2148_v54, %s2170_s17  ;;  %1120 = vrot.lane.b32.xlu0 %v990_v21, %s2170_s17 }
 0x4b0   :  { %1118 = vrot.lane.b32.xlu1 %v989_v40, %s2170_s17  ;;  %1124 = vrot.lane.b32.xlu0 %v992_v5, %s2170_s17 }
 0x4b4   :  { %1122 = vrot.lane.b32.xlu1 %v991_v38, %s2170_s17 }
 0x4b8   :  { %997 = vperm.xlu1 %1911, %v994_v4  }
 0x4dd   :  { %v2035_v24 = vpop.permute.xlu0 %2034 }
 0x4de   :  { %v2037_v60 = vunpack.i.h.bf16 %v2035_v24  ;;  %v2036_v45 = vunpack.i.l.bf16 %v2035_v24 }
 0x4e5   :  { %v2944_v39 = vpop.permute.xlu1 %2039 }
 0x4e6   :  { %v2042_v5 = vunpack.i.h.bf16 %v2944_v39  ;;  %v2041_v38 = vunpack.i.l.bf16 %v2944_v39 }
 0x4e9   :  { %v2948_v25 = vpop.permute.xlu1 %2044 }
 0x4ea   :  { %v2047_v48 = vunpack.i.h.bf16 %v2948_v25  ;;  %v2046_v15 = vunpack.i.l.bf16 %v2948_v25 }
 0x4ec   :  { %v1133_v9 = vsel %vm362_vm8, %v2046_v15, %v2047_v48 }
 0x4ed   :  { %v2958_v63 = vpop.permute.xlu0 %1112  ;;  %v2960_v8 = vpop.permute.xlu1 %2054  ;;  %v1607_v44 = vpack.c.bf16 %v1133_v9, %v1127_v33 }
 0x4ee   :  { %v2057_v30 = vunpack.i.h.bf16 %v2960_v8  ;;  %v2056_v43 = vunpack.i.l.bf16 %v2960_v8 }
 0x4ef   :  { %1608 = vmatprep.subr.bf16.mxu1 %v1607_v44  ;;  %v1128_v44 = vsel %vm362_vm8, %v2022_v13, %v2026_v46 }
 0x4f0   :  { %v1139_v23 = vsel %vm362_vm8, %v2056_v43, %v2057_v30 }
 0x4f1   :  { %v2065_v35 = vpop.permute.xlu1 %2064  ;;  %v2050_v31 = vpop.permute.xlu0 %2049 }
 0x4f2   :  { %v2052_v29 = vunpack.i.h.bf16 %v2050_v31  ;;  %v2051_v53 = vunpack.i.l.bf16 %v2050_v31  ;;  %v2066_v37 = vunpack.i.l.bf16 %v2065_v35  ;;  %v2067_v52 = vunpack.i.h.bf16 %v2065_v35 }
 0x4f3   :  { %v1129_v31 = vsel %vm362_vm8, %v2026_v46, %v2027_v57 }
 0x4f4   :  { %v1132_v49 = vsel %vm362_vm8, %v2052_v29, %v2046_v15  ;;  %v1126_v16 = vsel %vm362_vm8, %v2051_v53, %v2021_v62  ;;  %v1138_v36 = vsel %vm362_vm8, %v2066_v37, %v2056_v43 }
 0x4f5   :  { %v1609_v14 = vpack.c.bf16 %v1132_v49, %v1126_v16  ;;  %v2966_v22 = vpop.permute.xlu0 %2059 }
 0x4f6   :  { %v2062_v26 = vunpack.i.h.bf16 %v2966_v22  ;;  %v2061_v20 = vunpack.i.l.bf16 %v2966_v22  ;;  %v2970_v55 = vpop.permute.xlu1 %2074 }
 0x4f7   :  { %v2077_v19 = vunpack.i.h.bf16 %v2970_v55  ;;  %v2076_v27 = vunpack.i.l.bf16 %v2970_v55  ;;  %1610 = vmatpush1.bf16.msra.mxu1 %v1609_v14 }
 0x4f8   :  { %v1144_v10 = vsel %vm362_vm8, %v2067_v52, %v2061_v20  ;;  %v1145_v18 = vsel %vm362_vm8, %v2061_v20, %v2062_v26 }
 0x4f9   :  { %v1613_v0 = vpack.c.bf16 %v1144_v10, %v1138_v36  ;;  %v2982_v3 = vpop.permute.xlu0 %2069  ;;  %v1611_v6 = vpack.c.bf16 %v1145_v18, %v1139_v23  ;;  %v1156_v34 = vsel %vm362_vm8, %v2037_v60, %v2076_v27  ;;  %v1157_v50 = vsel %vm362_vm8, %v2076_v27, %v2077_v19 }
 0x4fa   :  { %v2072_v2 = vunpack.i.h.bf16 %v2982_v3  ;;  %v2071_v7 = vunpack.i.l.bf16 %v2982_v3  ;;  %v2986_v17 = vpop.permute.xlu1 %2079  ;;  %v2032_v23 = vunpack.i.h.bf16 %v2942_v42  ;;  %v2031_v18 = vunpack.i.l.bf16 %v2942_v42 }
 0x4fb   :  { %1612 = vmatprep.subr.bf16.mxu1 %v1611_v6  ;;  %v2082_v61 = vunpack.i.h.bf16 %v2986_v17  ;;  %v2081_v54 = vunpack.i.l.bf16 %v2986_v17 }
 0x4fc   :  { %v1150_v41 = vsel %vm362_vm8, %v2036_v45, %v2071_v7  ;;  %1614 = vmatpush1.bf16.msra.mxu1 %v1613_v0  ;;  %v1151_v21 = vsel %vm362_vm8, %v2071_v7, %v2072_v2  ;;  %v1131_v22 = vsel %vm362_vm8, %v2031_v18, %v2032_v23 }
 0x4fd   :  { %v1617_v32 = vpack.c.bf16 %v1156_v34, %v1150_v41  ;;  %v1615_v40 = vpack.c.bf16 %v1157_v50, %v1151_v21  ;;  %v1162_v35 = vsel %vm362_vm8, %v2041_v38, %v2081_v54  ;;  %v1163_v39 = vsel %vm362_vm8, %v2081_v54, %v2082_v61 }
 0x4fe   :  { %v2090_v4 = vpop.permute.xlu1 %2089  ;;  %v3002_v62 = vpop.permute.xlu0 %2084 }
 0x4ff   :  { %v2092_v24 = vunpack.i.h.bf16 %v2090_v4  ;;  %v2091_v15 = vunpack.i.l.bf16 %v2090_v4  ;;  %v2087_v33 = vunpack.i.h.bf16 %v3002_v62  ;;  %v2086_v9 = vunpack.i.l.bf16 %v3002_v62  ;;  %1616 = vmatprep.subr.bf16.mxu1 %v1615_v40 }
 0x500   :  { %1618 = vmatpush1.bf16.msra.mxu1 %v1617_v32 }
 0x501   :  { %v1134_v29 = vsel %vm362_vm8, %v2047_v48, %v2091_v15  ;;  %v1168_v53 = vsel %vm362_vm8, %v2042_v5, %v2086_v9  ;;  %v1169_v11 = vsel %vm362_vm8, %v2086_v9, %v2087_v33  ;;  %v1135_v13 = vsel %vm362_vm8, %v2091_v15, %v2092_v24 }
 0x502   :  { %v1625_v43 = vpack.c.bf16 %v1134_v29, %v1128_v44  ;;  %v1621_v37 = vpack.c.bf16 %v1168_v53, %v1162_v35  ;;  %v2095_v49 = vpop.permute.xlu1 %2094  ;;  %v2100_v16 = vpop.permute.xlu0 %2099  ;;  %v1619_v14 = vpack.c.bf16 %v1169_v11, %v1163_v39  ;;  %v1623_v52 = vpack.c.bf16 %v1135_v13, %v1129_v31 }
 0x503   :  { %v2101_v20 = vunpack.i.l.bf16 %v2100_v16  ;;  %v2097_v25 = vunpack.i.h.bf16 %v2095_v49  ;;  %v2096_v27 = vunpack.i.l.bf16 %v2095_v49  ;;  %v2102_v48 = vunpack.i.h.bf16 %v2100_v16 }
 0x504   :  { %1620 = vmatprep.subr.bf16.mxu1 %v1619_v14  ;;  %1624 = vmatprep.subr.bf16.mxu0 %v1623_v52 }
 0x505   :  { %1622 = vmatpush1.bf16.msra.mxu1 %v1621_v37  ;;  %1626 = vmatpush1.bf16.msra.mxu0 %v1625_v43  ;;  %v1140_v6 = vsel %vm362_vm8, %v2057_v30, %v2101_v20  ;;  %v1141_v7 = vsel %vm362_vm8, %v2101_v20, %v2102_v48  ;;  %v1137_v34 = vsel %vm362_vm8, %v2096_v27, %v2097_v25  ;;  %v3043_v30 = vld [vmem:[%s3168_s6] sm:$0xff] }
 0x506   :  { %v2105_v36 = vpop.permute.xlu1 %2104  ;;  %v1115_v10 = vpop.permute.xlu0 %1114  ;;  %v1136_v50 = vsel %vm362_vm8, %v2092_v24, %v2096_v27  ;;  %v1639_v40 = vpack.c.bf16 %v1137_v34, %v1131_v22 }
 0x507   :  { %v2107_v60 = vunpack.i.h.bf16 %v2105_v36  ;;  %v2106_v0 = vunpack.i.l.bf16 %v2105_v36  ;;  %v1174_v32 = vsel %vm362_vm8, %v2958_v63, %v1115_v10 }
 0x509   :  { %v1146_v45 = vsel %vm362_vm8, %v2062_v26, %v2106_v0  ;;  %v1147_v46 = vsel %vm362_vm8, %v2106_v0, %v2107_v60  ;;  %v1130_v26 = vsel %vm362_vm8, %v2027_v57, %v2031_v18 }
 0x50a   :  { %v1629_v41 = vpack.c.bf16 %v1146_v45, %v1140_v6  ;;  %v3036_v42 = vpop.permute.xlu1 %1116  ;;  %v2115_v54 = vpop.permute.xlu0 %2114  ;;  %v1627_v21 = vpack.c.bf16 %v1147_v46, %v1141_v7  ;;  %v1641_v5 = vpack.c.bf16 %v1136_v50, %v1130_v26 }
 0x50b   :  { %v1175_v8 = vsel %vm362_vm8, %v1115_v10, %v3036_v42  ;;  %v2117_v38 = vunpack.i.h.bf16 %v2115_v54  ;;  %v2116_v4 = vunpack.i.l.bf16 %v2115_v54 }
 0x50c   :  { %1253 = vmatprep.subr.mxu1 %v1175_v8  ;;  %1628 = vmatprep.subr.bf16.mxu0 %v1627_v21 }
 0x50d   :  { %1254 = vmatpush1.msra.mxu1 %v1174_v32  ;;  %1630 = vmatpush1.bf16.msra.mxu0 %v1629_v41  ;;  %v1148_v44 = vsel %vm362_vm8, %v2107_v60, %v2116_v4  ;;  %v1149_v31 = vsel %vm362_vm8, %v2116_v4, %v2117_v38 }
 0x50e   :  { %v2110_v24 = vpop.permute.xlu1 %2109  ;;  %v2125_v15 = vpop.permute.xlu0 %2124  ;;  %1556 = vmatmul.mubr.msk.f32.vlgmr.msra.gmra.mrb[2].mxu1 %vm471_vm9, %v3043_v30  ;;  %1640 = vmatprep.subr.bf16.mxu1 %v1639_v40 }
 0x50f   :  { %v2112_v12 = vunpack.i.h.bf16 %v2110_v24  ;;  %v2111_v9 = vunpack.i.l.bf16 %v2110_v24  ;;  %1642 = vmatpush1.bf16.msra.mxu1 %v1641_v5  ;;  %1443 = vmatprep.mubr.f32.mxu1 %v2171_v47  ;;  %v2127_v63 = vunpack.i.h.bf16 %v2125_v15  ;;  %v2126_v57 = vunpack.i.l.bf16 %v2125_v15 }
 0x511   :  { %v1142_v35 = vsel %vm362_vm8, %v2102_v48, %v2111_v9  ;;  %v1143_v39 = vsel %vm362_vm8, %v2111_v9, %v2112_v12  ;;  %v1158_v47 = vsel %vm362_vm8, %v2077_v19, %v2126_v57  ;;  %v1159_v49 = vsel %vm362_vm8, %v2126_v57, %v2127_v63 }
 0x512   :  { %v1645_v29 = vpack.c.bf16 %v1148_v44, %v1142_v35  ;;  %v2120_v53 = vpop.permute.xlu1 %2119  ;;  %v2135_v11 = vpop.permute.xlu0 %2134  ;;  %v1643_v13 = vpack.c.bf16 %v1149_v31, %v1143_v39 }
 0x513   :  { %v2122_v43 = vunpack.i.h.bf16 %v2120_v53  ;;  %v2121_v37 = vunpack.i.l.bf16 %v2120_v53  ;;  %v2137_v14 = vunpack.i.h.bf16 %v2135_v11  ;;  %v2136_v52 = vunpack.i.l.bf16 %v2135_v11 }
 0x514   :  { %1644 = vmatprep.subr.bf16.mxu1 %v1643_v13 }
 0x515   :  { %v1152_v16 = vsel %vm362_vm8, %v2072_v2, %v2121_v37  ;;  %1646 = vmatpush1.bf16.msra.mxu1 %v1645_v29  ;;  %v1153_v20 = vsel %vm362_vm8, %v2121_v37, %v2122_v43  ;;  %v1160_v18 = vsel %vm362_vm8, %v2127_v63, %v2136_v52  ;;  %v1161_v60 = vsel %vm362_vm8, %v2136_v52, %v2137_v14 }
 0x516   :  { %v1633_v25 = vpack.c.bf16 %v1158_v47, %v1152_v16  ;;  %v2130_v27 = vpop.permute.xlu1 %2129  ;;  %v2145_v48 = vpop.permute.xlu0 %2144  ;;  %v1631_v36 = vpack.c.bf16 %v1159_v49, %v1153_v20 }
 0x517   :  { %v2132_v10 = vunpack.i.h.bf16 %v2130_v27  ;;  %v2131_v55 = vunpack.i.l.bf16 %v2130_v27  ;;  %v2147_v23 = vunpack.i.h.bf16 %v2145_v48  ;;  %v2146_v19 = vunpack.i.l.bf16 %v2145_v48 }
 0x518   :  { %1632 = vmatprep.subr.bf16.mxu0 %v1631_v36 }
 0x519   :  { %v1154_v3 = vsel %vm362_vm8, %v2122_v43, %v2131_v55  ;;  %1634 = vmatpush1.bf16.msra.mxu0 %v1633_v25  ;;  %v1155_v2 = vsel %vm362_vm8, %v2131_v55, %v2132_v10  ;;  %v1170_v50 = vsel %vm362_vm8, %v2087_v33, %v2146_v19  ;;  %v1171_v41 = vsel %vm362_vm8, %v2146_v19, %v2147_v23 }
 0x51a   :  { %v1649_v0 = vpack.c.bf16 %v1160_v18, %v1154_v3  ;;  %v2140_v6 = vpop.permute.xlu1 %2139  ;;  %v2155_v45 = vpop.permute.xlu0 %2154  ;;  %v1647_v7 = vpack.c.bf16 %v1161_v60, %v1155_v2 }
 0x51b   :  { %v2142_v46 = vunpack.i.h.bf16 %v2140_v6  ;;  %v2141_v34 = vunpack.i.l.bf16 %v2140_v6  ;;  %v2157_v21 = vunpack.i.h.bf16 %v2155_v45  ;;  %v2156_v8 = vunpack.i.l.bf16 %v2155_v45 }
 0x51c   :  { %1648 = vmatprep.subr.bf16.mxu1 %v1647_v7 }
 0x51d   :  { %v1164_v54 = vsel %vm362_vm8, %v2082_v61, %v2141_v34  ;;  %1650 = vmatpush1.bf16.msra.mxu1 %v1649_v0  ;;  %v1165_v22 = vsel %vm362_vm8, %v2141_v34, %v2142_v46  ;;  %v1172_v33 = vsel %vm362_vm8, %v2147_v23, %v2156_v8  ;;  %v1173_v61 = vsel %vm362_vm8, %v2156_v8, %v2157_v21 }
 0x51e   :  { %v1637_v26 = vpack.c.bf16 %v1170_v50, %v1164_v54  ;;  %v2150_v32 = vpop.permute.xlu1 %2149  ;;  %v1635_v40 = vpack.c.bf16 %v1171_v41, %v1165_v22  ;;  %v1121_v62 = vpop.permute.xlu0 %1120 }
 0x51f   :  { %v2152_v5 = vunpack.i.h.bf16 %v2150_v32  ;;  %v2151_v38 = vunpack.i.l.bf16 %v2150_v32 }
 0x520   :  { %1636 = vmatprep.subr.bf16.mxu0 %v1635_v40 }
 0x521   :  { %v1166_v4 = vsel %vm362_vm8, %v2142_v46, %v2151_v38  ;;  %1638 = vmatpush1.bf16.msra.mxu0 %v1637_v26  ;;  %v1167_v17 = vsel %vm362_vm8, %v2151_v38, %v2152_v5 }
 0x522   :  { %v1653_v24 = vpack.c.bf16 %v1172_v33, %v1166_v4  ;;  %v1119_v15 = vpop.permute.xlu1 %1118  ;;  %v1651_v12 = vpack.c.bf16 %v1173_v61, %v1167_v17  ;;  %v1125_v57 = vpop.permute.xlu0 %1124 }
 0x523   :  { %v1176_v9 = vsel %vm362_vm8, %v3036_v42, %v1119_v15  ;;  %v1177_v63 = vsel %vm362_vm8, %v1119_v15, %v1121_v62 }
 0x524   :  { %1324 = vmatprep.subr.mxu0 %v1177_v63  ;;  %1652 = vmatprep.subr.bf16.mxu1 %v1651_v12 }
 0x525   :  { %1325 = vmatpush1.msra.mxu0 %v1176_v9  ;;  %1654 = vmatpush1.bf16.msra.mxu1 %v1653_v24  ;;  %v1450_v9 = vld [vmem:[%s3169_s8] sm:$0xff] }
 0x526   :  { %v1123_v44 = vpop.permute.xlu1 %1122  ;;  %1557 = vmatmul.mubr.msk.f32.vlgmr.msra.gmra.mrb[4].mxu0 %vm471_vm9, %v3043_v30 }
 0x527   :  { %v1178_v35 = vsel %vm362_vm8, %v1121_v62, %v1123_v44  ;;  %v1179_v39 = vsel %vm362_vm8, %v1123_v44, %v1125_v57  ;;  %v1451_v44 = vld [vmem:[%s3170_s9] sm:$0xff] }
 0x528   :  { %1395 = vmatprep.subr.mxu1 %v1179_v39 }
 0x529   :  { %1396 = vmatpush1.msra.mxu1 %v1178_v35 }
 0x52a   :  { %1558 = vmatmul.mubr.msk.f32.vlgmr.msra.gmra.mrb[4].mxu1 %vm471_vm9, %v3043_v30 }
 0x537   :  { %v998_v29 = vpop.permute.xlu1 %997 }
 0x5e1   :  { %v1303_v42 = vpop.f32.mrb[2].mxu1 }
 0x5e2   :  { %v1305_v31 = vpop.f32.mrb[3].mxu1  ;;  %v3091_v53 = vadd.f32 %v1303_v42, %v998_v29 }
 0x5e3   :  { %v3093_v11 = vadd.f32 %v1305_v31, %v998_v29 }
 0x5e4   :  { %v1452_v13 = vmul.f32 %v3091_v53, %v2643_v28 }
 0x5e5   :  { %v1453_v43 = vmul.f32 %v3093_v11, %v2649_v58 }
 0x5e7   :  { %v1458_v14 = vadd.f32 %v1453_v43, %v1452_v13 }
 0x5f9   :  { %v1374_v37 = vpop.f32.mrb[4].mxu0 }
 0x5fa   :  { %v1375_v47 = vadd.f32 %v1374_v37, %v998_v29  ;;  %v1376_v49 = vpop.f32.mrb[5].mxu0  ;;  %v1497_v37 = vld [vmem:[%s3161_s0 + $0x8] sm:$0xff] }
 0x5fb   :  { %v1377_v16 = vadd.f32 %v1376_v49, %v998_v29 }
 0x5fc   :  { %v1454_v30 = vmul.f32 %v1375_v47, %v2655_v51 }
 0x5fd   :  { %v1455_v52 = vmul.f32 %v1377_v16, %v2657_v59  ;;  %v1445_v20 = vpop.f32.mrb[4].mxu1 }
 0x5fe   :  { %v1459_v25 = vadd.f32 %v1458_v14, %v1454_v30  ;;  %v1446_v27 = vadd.f32 %v1445_v20, %v998_v29  ;;  %v1447_v48 = vpop.f32.mrb[5].mxu1  ;;  %v1498_v30 = vld [vmem:[%s3161_s0 + $0x10] sm:$0xff] }
 0x5ff   :  { %v1448_v36 = vadd.f32 %v1447_v48, %v998_v29 }
 0x600   :  { %v1460_v10 = vadd.f32 %v1459_v25, %v1455_v52  ;;  %v1456_v55 = vmul.f32 %v1446_v27, %v2665_v1  ;;  %v1499_v52 = vld [vmem:[%s3161_s0 + $0x18] sm:$0xff] }
 0x601   :  { %v1457_v23 = vmul.f32 %v1448_v36, %v2669_v56 }
 0x602   :  { %v1461_v19 = vadd.f32 %v1460_v10, %v1456_v55 }
 0x604   :  { %v1462_v18 = vadd.f32 %v1461_v19, %v1457_v23 }
 0x606   :  { %1463 = vadd.xlane.f32.xlu0 %v1462_v18 }
 0x693   :  { %v1464_v3 = vpop.xlane.xlu0 %1463 }
 0x694   :  { %v1465_v2 = vmul.f32 0.001953125, %v1464_v3 }
 0x696   :  { %v1466_v60 = vsub.f32 %v3091_v53, %v1465_v2  ;;  %v1467_v0 = vsub.f32 %v3093_v11, %v1465_v2  ;;  %v1468_v6 = vsub.f32 %v1375_v47, %v1465_v2  ;;  %v1469_v45 = vsub.f32 %v1377_v16, %v1465_v2 }
 0x697   :  { %v1470_v7 = vsub.f32 %v1446_v27, %v1465_v2  ;;  %v1471_v41 = vsub.f32 %v1448_v36, %v1465_v2 }
 0x698   :  { %v1472_v46 = vmul.f32 %v1466_v60, %v2643_v28  ;;  %v1473_v34 = vmul.f32 %v1467_v0, %v2649_v58  ;;  %v1474_v50 = vmul.f32 %v1468_v6, %v2655_v51  ;;  %v1475_v54 = vmul.f32 %v1469_v45, %v2657_v59 }
 0x699   :  { %v1476_v22 = vmul.f32 %v1470_v7, %v2665_v1  ;;  %v1477_v40 = vmul.f32 %v1471_v41, %v2669_v56 }
 0x69a   :  { %v1478_v21 = vmul.f32 %v1472_v46, %v1472_v46  ;;  %v1479_v8 = vmul.f32 %v1473_v34, %v1473_v34  ;;  %v1480_v26 = vmul.f32 %v1474_v50, %v1474_v50  ;;  %v1481_v5 = vmul.f32 %v1475_v54, %v1475_v54 }
 0x69b   :  { %v1482_v62 = vmul.f32 %v1476_v22, %v1476_v22  ;;  %v1483_v4 = vmul.f32 %v1477_v40, %v1477_v40 }
 0x69c   :  { %v1484_v32 = vadd.f32 %v1479_v8, %v1478_v21 }
 0x69e   :  { %v1485_v38 = vadd.f32 %v1484_v32, %v1480_v26 }
 0x6a0   :  { %v1486_v33 = vadd.f32 %v1485_v38, %v1481_v5 }
 0x6a2   :  { %v1487_v17 = vadd.f32 %v1486_v33, %v1482_v62 }
 0x6a4   :  { %v1488_v61 = vadd.f32 %v1487_v17, %v1483_v4 }
 0x6a6   :  { %1489 = vadd.xlane.f32.xlu1 %v1488_v61 }
 0x733   :  { %v1490_v24 = vpop.xlane.xlu1 %1489 }
 0x734   :  { %v1491_v15 = vmul.f32 0.001953125, %v1490_v24 }
 0x736   :  { %v1492_v12 = vadd.f32 1e-05, %v1491_v15 }
 0x738   :  { %2160 = vrsqrt.f32 %v1492_v12 }
 0x742   :  { %v2161_v63 = vpop.eup %2160 }
 0x743   :  { %v1494_v57 = vmul.f32 %v2161_v63, %v1450_v9 }
 0x745   :  { %1505 = vperm.xlu0 %1912, %v1494_v57   ;;  %v1495_v35 = vmul.f32 %v1494_v57, %v1465_v2 }
 0x747   :  { %v1496_v39 = vsub.f32 %v1451_v44, %v1495_v35 }
 0x749   :  { %1516 = vperm.xlu1 %1911, %v1496_v39  }
 0x7c4   :  { %v1506_v42 = vpop.permute.xlu0 %1505 }
 0x7c5   :  { %v1508_v31 = vmul.f32 %v1506_v42, %v3091_v53  ;;  %v1509_v29 = vmul.f32 %v1506_v42, %v3093_v11  ;;  %v1510_v13 = vmul.f32 %v1506_v42, %v1375_v47  ;;  %v1511_v43 = vmul.f32 %v1506_v42, %v1377_v16  ;;  %v1500_v53 = vld [vmem:[%s3161_s0 + $0x20] sm:$0xff]  ;;  %v1501_v47 = vld [vmem:[%s3161_s0 + $0x28] sm:$0xff]  ;;  %v1502_v16 = vld [vmem:[%s3161_s0 + $0x30] sm:$0xff] }
 0x7c6   :  { %v1512_v49 = vmul.f32 %v1506_v42, %v1446_v27  ;;  %v1513_v14 = vmul.f32 %v1506_v42, %v1448_v36 }
 0x7c8   :  { %v1517_v11 = vpop.permute.xlu1 %1516 }
 0x7c9   :  { %v1519_v20 = vadd.f32 %v1517_v11, %v1508_v31  ;;  %v1520_v25 = vadd.f32 %v1517_v11, %v1509_v29  ;;  %v1521_v27 = vadd.f32 %v1517_v11, %v1510_v13  ;;  %v1522_v48 = vadd.f32 %v1517_v11, %v1511_v43 }
 0x7ca   :  { %v1523_v36 = vadd.f32 %v1517_v11, %v1512_v49  ;;  %v1524_v10 = vadd.f32 %v1517_v11, %v1513_v14 }
 0x7cb   :  { %v1525_v55 = vadd.f32 %v1519_v20, %v1497_v37  ;;  %v1526_v23 = vadd.f32 %v1520_v25, %v1498_v30  ;;  %v1527_v19 = vadd.f32 %v1521_v27, %v1499_v52  ;;  %v1528_v18 = vadd.f32 %v1522_v48, %v1500_v53 }
 0x7cc   :  { %v1529_v3 = vadd.f32 %v1523_v36, %v1501_v47  ;;  %v1530_v2 = vadd.f32 %v1524_v10, %v1502_v16 }
 0x7cd   :  { %v1531_v60 = vmax.f32 %v1525_v55, 0.0  ;;  %v1532_v0 = vmax.f32 %v1526_v23, 0.0  ;;  %v1533_v6 = vmax.f32 %v1527_v19, 0.0  ;;  %v1534_v45 = vmax.f32 %v1528_v18, 0.0 }
 0x7ce   :  { %v1535_v7 = vmax.f32 %v1529_v3, 0.0  ;;  %v1536_v46 = vmax.f32 %v1530_v2, 0.0 }
 0x7cf   :  { %v1537_v34 = vmul.f32 %v1531_v60, %v2643_v28  ;;  %v1538_v50 = vmul.f32 %v1532_v0, %v2649_v58  ;;  %v1539_v41 = vmul.f32 %v1533_v6, %v2655_v51  ;;  %v1540_v54 = vmul.f32 %v1534_v45, %v2657_v59 }
 0x7d0   :  { %v1541_v21 = vmul.f32 %v1535_v7, %v2665_v1  ;;  %v1542_v8 = vmul.f32 %v1536_v46, %v2669_v56 }
 0x7d1   :  { %1543 = vst [vmem:[%s3171_s10] sm:$0xff] %v1537_v34  ;;  %1544 = vst [vmem:[%s3171_s10 + $0x8] sm:$0xff] %v1538_v50 }
 0x7d2   :  { %1545 = vst [vmem:[%s3171_s10 + $0x10] sm:$0xff] %v1539_v41  ;;  %1546 = vst [vmem:[%s3171_s10 + $0x18] sm:$0xff] %v1540_v54 }
 0x7d3   :  { %1547 = vst [vmem:[%s3171_s10 + $0x20] sm:$0xff] %v1541_v21  ;;  %1548 = vst [vmem:[%s3171_s10 + $0x28] sm:$0xff] %v1542_v8 }

</bundles_post_ra>
